<compile_context>
chip_gen: v7x
topology: tpu7x:2x2x1
jax: 0.10.0
libtpu: 0.0.40
codegen_flags: <defaults>
</compile_context>

<pallas_src>
import functools
import math

import jax
import jax.numpy as jnp
from jax.experimental import pallas as pl
from jax.experimental.pallas import tpu as pltpu


# ------------------------------- kernel helpers -------------------------------

def _layer_norm(x, gamma, beta, eps=1e-6):
    # matches nn.LayerNorm(d_model, eps=1e-6): mean/var over the last dim
    mu = jnp.mean(x, axis=-1, keepdims=True)
    var = jnp.mean((x - mu) * (x - mu), axis=-1, keepdims=True)
    return (x - mu) * jax.lax.rsqrt(var + eps) * gamma + beta


def _gelu_tanh(x):
    # PreSumm's gelu (tanh approximation)
    c = math.sqrt(2.0 / math.pi)
    return 0.5 * x * (1.0 + jnp.tanh(c * (x + 0.044715 * x * x * x)))


# --------------------------------- the kernel ---------------------------------

def _encoder_layer_kernel(
    xq_ref, xkv_ref, bias_ref,
    ln1_g_ref, ln1_b_ref,
    wq_ref, bq_ref, wk_ref, wv_ref, bv_ref, wo_ref, bo_ref,
    ln2_g_ref, ln2_b_ref,
    w1_ref, b1_ref, w2_ref, b2_ref,
    out_ref,
    *, heads, apply_input_norm):
    xq = xq_ref[0]          # [TQ, D] f32 — query / residual tile
    xkv = xkv_ref[0]        # [L, D]  f32 — full sequence (keys / values)
    bias = bias_ref[0]      # [1, L]  f32 additive mask bias (-1e18 on padded keys)
    TQ, D = xq.shape
    dh = D // heads
    scale = 1.0 / math.sqrt(dh)

    # ---- optional input LayerNorm (iter != 0), f32 stats ----
    if apply_input_norm:
        xnq = _layer_norm(xq, ln1_g_ref[...], ln1_b_ref[...])
        xnkv = _layer_norm(xkv, ln1_g_ref[...], ln1_b_ref[...])
    else:
        xnq = xq
        xnkv = xkv

    # ---- full-width lane-dense projections on the MXU (bf16 in, f32 acc) ----
    xnq_b = xnq.astype(jnp.bfloat16)
    xnkv_b = xnkv.astype(jnp.bfloat16)
    q = jnp.dot(xnq_b, wq_ref[...], preferred_element_type=jnp.float32) + bq_ref[...]
    # bk is dropped on purpose: q·bk is constant over keys, softmax cancels it exactly
    k = jnp.dot(xnkv_b, wk_ref[...], preferred_element_type=jnp.float32)
    v = jnp.dot(xnkv_b, wv_ref[...], preferred_element_type=jnp.float32) + bv_ref[...]

    q_b = (q * scale).astype(jnp.bfloat16)
    k_b = k.astype(jnp.bfloat16)
    v_b = v.astype(jnp.bfloat16)

    # ---- per-head attention on static lane-slices of the full-width Q/K/V ----
    # TODO(synk): for large head counts convert to lax.fori_loop(unroll=True) to
    # bound live ranges; heads is small here so a static unroll is fine.
    ctx_parts = []
    for h in range(heads):
        sl = slice(h * dh, (h + 1) * dh)
        scores = jax.lax.dot_general(
            q_b[:, sl], k_b[:, sl], (((1,), (1,)), ((), ())),
            preferred_element_type=jnp.float32)                   # [TQ, L]
        scores = scores + bias                                    # additive mask bias
        m = jnp.max(scores, axis=-1, keepdims=True)
        e = jnp.exp(scores - m)
        s = jnp.sum(e, axis=-1, keepdims=True)
        p = e * pl.reciprocal(s, approx=True)                     # EUP reciprocal
        ctx_parts.append(
            jnp.dot(p.astype(jnp.bfloat16), v_b[:, sl],
                    preferred_element_type=jnp.float32))          # [TQ, dh]
    ctx = jnp.concatenate(ctx_parts, axis=-1)                     # [TQ, D]

    # ---- single full-width output projection + residual with raw inputs ----
    attn_out = jnp.dot(ctx.astype(jnp.bfloat16), wo_ref[...],
                       preferred_element_type=jnp.float32) + bo_ref[...]
    out1 = attn_out + xq       # dropout(context) is identity in eval mode

    # ---- PositionwiseFeedForward: LN -> W1 -> gelu -> W2 -> residual ----
    xn2 = _layer_norm(out1, ln2_g_ref[...], ln2_b_ref[...])
    hdn = _gelu_tanh(jnp.dot(xn2.astype(jnp.bfloat16), w1_ref[...],
                             preferred_element_type=jnp.float32) + b1_ref[...])
    y = jnp.dot(hdn.astype(jnp.bfloat16), w2_ref[...],
                preferred_element_type=jnp.float32) + b2_ref[...]
    out_ref[0] = (y + out1).astype(out_ref.dtype)


# --------------------------------- the wrapper ---------------------------------

def _pick_q_tile(L):
    # second grid axis over query tiles (K/V stay full-sequence per step)
    for cand in (256, 128):
        if L % cand == 0:
            return cand
    return L


def transformer_encoder_layer(iter_idx, query, inputs, mask, params, heads):
    """query is accepted (to mirror the PyTorch signature) but unused, exactly like
    the reference module, which uses input_norm for q, k and v."""
    del query
    B, L, D = inputs.shape
    d_ff = params["w1"].shape[1]
    tq = _pick_q_tile(L)
    n_qt = L // tq

    inputs = inputs.astype(jnp.float32)
    # precomputed additive mask bias: -1e18 on padded key positions, 0 elsewhere
    mask_bias = jnp.where(mask > 0, -1e18, 0.0).astype(jnp.float32).reshape(B, 1, L)

    bf = lambda w: w.astype(jnp.bfloat16)                   # MXU operands
    row = lambda b: b.reshape(1, -1).astype(jnp.float32)    # lane-dense [1, N] adds

    ordered = [
        row(params["ln1_g"]), row(params["ln1_b"]),
        bf(params["wq"]), row(params["bq"]),
        bf(params["wk"]),
        bf(params["wv"]), row(params["bv"]),
        bf(params["wo"]), row(params["bo"]),
        row(params["ln2_g"]), row(params["ln2_b"]),
        bf(params["w1"]), row(params["b1"]),
        bf(params["w2"]), row(params["b2"]),
    ]

    # TODO(synk): single-buffer the grid-invariant weight specs via
    # pipeline_mode=pl.Buffered(1) once verified on the deployed jax version;
    # at realistic D/d_ff this halves weight VMEM.
    def full_spec(arr):
        nd = arr.ndim
        return pl.BlockSpec(arr.shape, lambda b, t, _nd=nd: (0,) * _nd)

    in_specs = [
        pl.BlockSpec((1, tq, D), lambda b, t: (b, t, 0)),    # query / residual tile
        pl.BlockSpec((1, L, D), lambda b, t: (b, 0, 0)),     # full sequence for K/V
        pl.BlockSpec((1, 1, L), lambda b, t: (b, 0, 0)),     # additive mask bias
    ] + [full_spec(a) for a in ordered]

    kernel = functools.partial(
        _encoder_layer_kernel, heads=heads, apply_input_norm=(iter_idx != 0))

    # scoped-VMEM budget from the actual resident set (weights + pipelined
    # activation tiles + in-kernel temporaries), with headroom, well below physical.
    weight_bytes = sum(a.size * a.dtype.itemsize for a in ordered)
    act_bytes = 4 * (tq * D + L * D + L + tq * D)            # x_q, x_kv, mask, out
    tmp_bytes = 4 * (3 * L * D + heads * tq * L + tq * d_ff)
    vmem_limit = int(min(100 * 2**20,
                         max(4 * 2**20, 2 * weight_bytes + 2 * act_bytes + tmp_bytes)))

    return pl.pallas_call(
        kernel,
        out_shape=jax.ShapeDtypeStruct((B, L, D), jnp.float32),
        grid=(B, n_qt),
        in_specs=in_specs,
        out_specs=pl.BlockSpec((1, tq, D), lambda b, t: (b, t, 0)),
        compiler_params=pltpu.CompilerParams(
            dimension_semantics=("parallel", "parallel"),
            vmem_limit_bytes=vmem_limit),
    )(inputs, inputs, mask_bias, *ordered)


# ----------------------------- params + reference ------------------------------

def init_params(key, d_model, heads, d_ff):
    del heads
    ks = jax.random.split(key, 8)
    s = 0.02
    wq = jax.random.normal(ks[0], (d_model, d_model), jnp.float32) * s
    wk = jax.random.normal(ks[1], (d_model, d_model), jnp.float32) * s
    wv = jax.random.normal(ks[2], (d_model, d_model), jnp.float32) * s
    wo = jax.random.normal(ks[3], (d_model, d_model), jnp.float32) * s
    bq = jax.random.normal(ks[4], (d_model,), jnp.float32) * s
    bk = jax.random.normal(ks[5], (d_model,), jnp.float32) * s
    bv = jax.random.normal(ks[6], (d_model,), jnp.float32) * s
    bo = jax.random.normal(ks[7], (d_model,), jnp.float32) * s
    kf = jax.random.split(jax.random.fold_in(key, 1), 4)
    w1 = jax.random.normal(kf[0], (d_model, d_ff), jnp.float32) * s
    b1 = jax.random.normal(kf[1], (d_ff,), jnp.float32) * s
    w2 = jax.random.normal(kf[2], (d_ff, d_model), jnp.float32) * s
    b2 = jax.random.normal(kf[3], (d_model,), jnp.float32) * s
    return dict(
        wq=wq, wk=wk, wv=wv, wo=wo, bq=bq, bk=bk, bv=bv, bo=bo,
        ln1_g=jnp.ones((d_model,), jnp.float32), ln1_b=jnp.zeros((d_model,), jnp.float32),
        ln2_g=jnp.ones((d_model,), jnp.float32), ln2_b=jnp.zeros((d_model,), jnp.float32),
        w1=w1, b1=b1, w2=w2, b2=b2)


def reference(iter_idx, inputs, mask, p, heads):
    """Pure-JAX (f32) mirror of the PyTorch forward (eval mode, dropout = identity)."""
    B, L, D = inputs.shape
    dh = D // heads
    x = inputs
    xn = _layer_norm(x, p["ln1_g"], p["ln1_b"]) if iter_idx != 0 else x

    def proj(w, b):
        y = jnp.einsum("bld,de->ble", xn, w) + b
        return y.reshape(B, L, heads, dh).transpose(0, 2, 1, 3)   # [B, H, L, dh]

    q = proj(p["wq"], p["bq"]) / math.sqrt(dh)
    k = proj(p["wk"], p["bk"])
    v = proj(p["wv"], p["bv"])
    scores = jnp.einsum("bhld,bhmd->bhlm", q, k)
    scores = jnp.where(mask[:, None, None, :] > 0, -1e18, scores)
    attn = jax.nn.softmax(scores, axis=-1)
    ctx = jnp.einsum("bhlm,bhmd->bhld", attn, v)
    ctx = ctx.transpose(0, 2, 1, 3).reshape(B, L, D)
    attn_out = jnp.einsum("bld,de->ble", ctx, p["wo"]) + p["bo"]
    out1 = attn_out + x
    xn2 = _layer_norm(out1, p["ln2_g"], p["ln2_b"])
    hdn = _gelu_tanh(jnp.einsum("bld,df->blf", xn2, p["w1"]) + p["b1"])
    y = jnp.einsum("blf,fd->bld", hdn, p["w2"]) + p["b2"]
    return y + out1


# ------------------------------------ main ------------------------------------

if __name__ == "__main__":
    B, L = 2, 8
    d_model, heads, d_ff = 32, 4, 64
    iter_idx = 1  # iter != 0 -> input LayerNorm is applied (as in the PyTorch module)

    key = jax.random.PRNGKey(0)
    k_x, k_p = jax.random.split(key)
    inputs = jax.random.normal(k_x, (B, L, d_model), jnp.float32)
    # mask: 1.0 marks padded key positions (last two positions of batch 1 are padded)
    mask = jnp.zeros((B, L), jnp.float32).at[1, -2:].set(1.0)

    params = init_params(k_p, d_model, heads, d_ff)

    out = transformer_encoder_layer(iter_idx, inputs, inputs, mask, params, heads)
    out = jax.block_until_ready(out)

    ref = reference(iter_idx, inputs, mask, params, heads)
    assert out.shape == (B, L, d_model)
    # bf16 MXU operands + approx reciprocal -> slightly looser tolerance than pure f32
    assert jnp.allclose(out, ref, atol=1e-2, rtol=1e-2), float(jnp.max(jnp.abs(out - ref)))

    print("KERNEL_OK")
</pallas_src>

<mosaic_0001>
module attributes {stable_mosaic.version = 11 : i64} {
  func.func @_encoder_layer_kernel(%arg0: i32, %arg1: i32, %arg2: memref<1x8x32xf32, #tpu.memory_space<vmem>>, %arg3: memref<1x8x32xf32, #tpu.memory_space<vmem>>, %arg4: memref<1x1x8xf32, #tpu.memory_space<vmem>>, %arg5: memref<1x32xf32, #tpu.memory_space<vmem>>, %arg6: memref<1x32xf32, #tpu.memory_space<vmem>>, %arg7: memref<32x32xbf16, #tpu.memory_space<vmem>>, %arg8: memref<1x32xf32, #tpu.memory_space<vmem>>, %arg9: memref<32x32xbf16, #tpu.memory_space<vmem>>, %arg10: memref<32x32xbf16, #tpu.memory_space<vmem>>, %arg11: memref<1x32xf32, #tpu.memory_space<vmem>>, %arg12: memref<32x32xbf16, #tpu.memory_space<vmem>>, %arg13: memref<1x32xf32, #tpu.memory_space<vmem>>, %arg14: memref<1x32xf32, #tpu.memory_space<vmem>>, %arg15: memref<1x32xf32, #tpu.memory_space<vmem>>, %arg16: memref<32x64xbf16, #tpu.memory_space<vmem>>, %arg17: memref<1x64xf32, #tpu.memory_space<vmem>>, %arg18: memref<64x32xbf16, #tpu.memory_space<vmem>>, %arg19: memref<1x32xf32, #tpu.memory_space<vmem>>, %arg20: memref<1x8x32xf32, #tpu.memory_space<vmem>>) attributes {dimension_semantics = [#tpu.dimension_semantics<parallel>, #tpu.dimension_semantics<parallel>], iteration_bounds = array<i64: 2, 1>, scalar_prefetch = 0 : i64, scratch_operands = 0 : i64, tpu.core_type = #tpu.core_type<tc>, window_params = [{transform_indices = @transform_0, window_bounds = array<i64: 1, 8, 32>}, {transform_indices = @transform_1, window_bounds = array<i64: 1, 8, 32>}, {transform_indices = @transform_2, window_bounds = array<i64: 1, 1, 8>}, {pipeline_mode = #tpu.pipeline_mode<synchronous>, transform_indices = @transform_3, window_bounds = array<i64: 1, 32>}, {pipeline_mode = #tpu.pipeline_mode<synchronous>, transform_indices = @transform_4, window_bounds = array<i64: 1, 32>}, {pipeline_mode = #tpu.pipeline_mode<synchronous>, transform_indices = @transform_5, window_bounds = array<i64: 32, 32>}, {pipeline_mode = #tpu.pipeline_mode<synchronous>, transform_indices = @transform_6, window_bounds = array<i64: 1, 32>}, {pipeline_mode = #tpu.pipeline_mode<synchronous>, transform_indices = @transform_7, window_bounds = array<i64: 32, 32>}, {pipeline_mode = #tpu.pipeline_mode<synchronous>, transform_indices = @transform_8, window_bounds = array<i64: 32, 32>}, {pipeline_mode = #tpu.pipeline_mode<synchronous>, transform_indices = @transform_9, window_bounds = array<i64: 1, 32>}, {pipeline_mode = #tpu.pipeline_mode<synchronous>, transform_indices = @transform_10, window_bounds = array<i64: 32, 32>}, {pipeline_mode = #tpu.pipeline_mode<synchronous>, transform_indices = @transform_11, window_bounds = array<i64: 1, 32>}, {pipeline_mode = #tpu.pipeline_mode<synchronous>, transform_indices = @transform_12, window_bounds = array<i64: 1, 32>}, {pipeline_mode = #tpu.pipeline_mode<synchronous>, transform_indices = @transform_13, window_bounds = array<i64: 1, 32>}, {pipeline_mode = #tpu.pipeline_mode<synchronous>, transform_indices = @transform_14, window_bounds = array<i64: 32, 64>}, {pipeline_mode = #tpu.pipeline_mode<synchronous>, transform_indices = @transform_15, window_bounds = array<i64: 1, 64>}, {pipeline_mode = #tpu.pipeline_mode<synchronous>, transform_indices = @transform_16, window_bounds = array<i64: 64, 32>}, {pipeline_mode = #tpu.pipeline_mode<synchronous>, transform_indices = @transform_17, window_bounds = array<i64: 1, 32>}, {transform_indices = @transform_18, window_bounds = array<i64: 1, 8, 32>}]} {
    %c0 = arith.constant 0 : index
    %c0_0 = arith.constant 0 : index
    %c0_1 = arith.constant 0 : index
    %0 = vector.load %arg2[%c0, %c0_0, %c0_1] : memref<1x8x32xf32, #tpu.memory_space<vmem>>, vector<1x8x32xf32>
    %1 = vector.shape_cast %0 : vector<1x8x32xf32> to vector<8x32xf32>
    %c0_2 = arith.constant 0 : index
    %c0_3 = arith.constant 0 : index
    %c0_4 = arith.constant 0 : index
    %2 = vector.load %arg3[%c0_2, %c0_3, %c0_4] : memref<1x8x32xf32, #tpu.memory_space<vmem>>, vector<1x8x32xf32>
    %3 = vector.shape_cast %2 : vector<1x8x32xf32> to vector<8x32xf32>
    %c0_5 = arith.constant 0 : index
    %c0_6 = arith.constant 0 : index
    %c0_7 = arith.constant 0 : index
    %4 = vector.load %arg4[%c0_5, %c0_6, %c0_7] : memref<1x1x8xf32, #tpu.memory_space<vmem>>, vector<1x1x8xf32>
    %5 = vector.shape_cast %4 : vector<1x1x8xf32> to vector<1x8xf32>
    %c0_8 = arith.constant 0 : index
    %c0_9 = arith.constant 0 : index
    %6 = vector.load %arg5[%c0_8, %c0_9] : memref<1x32xf32, #tpu.memory_space<vmem>>, vector<1x32xf32>
    %c0_10 = arith.constant 0 : index
    %c0_11 = arith.constant 0 : index
    %7 = vector.load %arg6[%c0_10, %c0_11] : memref<1x32xf32, #tpu.memory_space<vmem>>, vector<1x32xf32>
    %cst = arith.constant dense<0.000000e+00> : vector<8xf32>
    %8 = vector.multi_reduction <add>, %1, %cst [1] : vector<8x32xf32> to vector<8xf32>
    %9 = vector.shape_cast %8 : vector<8xf32> to vector<8x1xf32>
    %cst_12 = arith.constant 3.200000e+01 : f32
    %10 = vector.broadcast %cst_12 : f32 to vector<8x1xf32>
    %11 = arith.divf %9, %10 : vector<8x1xf32>
    %12 = vector.broadcast %11 : vector<8x1xf32> to vector<8x32xf32>
    %13 = arith.subf %1, %12 : vector<8x32xf32>
    %14 = vector.broadcast %11 : vector<8x1xf32> to vector<8x32xf32>
    %15 = arith.subf %1, %14 : vector<8x32xf32>
    %16 = arith.mulf %13, %15 : vector<8x32xf32>
    %cst_13 = arith.constant dense<0.000000e+00> : vector<8xf32>
    %17 = vector.multi_reduction <add>, %16, %cst_13 [1] : vector<8x32xf32> to vector<8xf32>
    %18 = vector.shape_cast %17 : vector<8xf32> to vector<8x1xf32>
    %cst_14 = arith.constant 3.200000e+01 : f32
    %19 = vector.broadcast %cst_14 : f32 to vector<8x1xf32>
    %20 = arith.divf %18, %19 : vector<8x1xf32>
    %21 = vector.broadcast %11 : vector<8x1xf32> to vector<8x32xf32>
    %22 = arith.subf %1, %21 : vector<8x32xf32>
    %cst_15 = arith.constant 9.99999997E-7 : f32
    %23 = vector.broadcast %cst_15 : f32 to vector<8x1xf32>
    %24 = arith.addf %20, %23 : vector<8x1xf32>
    %25 = math.rsqrt %24 : vector<8x1xf32>
    %26 = vector.broadcast %25 : vector<8x1xf32> to vector<8x32xf32>
    %27 = arith.mulf %22, %26 : vector<8x32xf32>
    %28 = vector.broadcast %6 : vector<1x32xf32> to vector<8x32xf32>
    %29 = arith.mulf %27, %28 : vector<8x32xf32>
    %30 = vector.broadcast %7 : vector<1x32xf32> to vector<8x32xf32>
    %31 = arith.addf %29, %30 : vector<8x32xf32>
    %c0_16 = arith.constant 0 : index
    %c0_17 = arith.constant 0 : index
    %32 = vector.load %arg5[%c0_16, %c0_17] : memref<1x32xf32, #tpu.memory_space<vmem>>, vector<1x32xf32>
    %c0_18 = arith.constant 0 : index
    %c0_19 = arith.constant 0 : index
    %33 = vector.load %arg6[%c0_18, %c0_19] : memref<1x32xf32, #tpu.memory_space<vmem>>, vector<1x32xf32>
    %cst_20 = arith.constant dense<0.000000e+00> : vector<8xf32>
    %34 = vector.multi_reduction <add>, %3, %cst_20 [1] : vector<8x32xf32> to vector<8xf32>
    %35 = vector.shape_cast %34 : vector<8xf32> to vector<8x1xf32>
    %cst_21 = arith.constant 3.200000e+01 : f32
    %36 = vector.broadcast %cst_21 : f32 to vector<8x1xf32>
    %37 = arith.divf %35, %36 : vector<8x1xf32>
    %38 = vector.broadcast %37 : vector<8x1xf32> to vector<8x32xf32>
    %39 = arith.subf %3, %38 : vector<8x32xf32>
    %40 = vector.broadcast %37 : vector<8x1xf32> to vector<8x32xf32>
    %41 = arith.subf %3, %40 : vector<8x32xf32>
    %42 = arith.mulf %39, %41 : vector<8x32xf32>
    %cst_22 = arith.constant dense<0.000000e+00> : vector<8xf32>
    %43 = vector.multi_reduction <add>, %42, %cst_22 [1] : vector<8x32xf32> to vector<8xf32>
    %44 = vector.shape_cast %43 : vector<8xf32> to vector<8x1xf32>
    %cst_23 = arith.constant 3.200000e+01 : f32
    %45 = vector.broadcast %cst_23 : f32 to vector<8x1xf32>
    %46 = arith.divf %44, %45 : vector<8x1xf32>
    %47 = vector.broadcast %37 : vector<8x1xf32> to vector<8x32xf32>
    %48 = arith.subf %3, %47 : vector<8x32xf32>
    %cst_24 = arith.constant 9.99999997E-7 : f32
    %49 = vector.broadcast %cst_24 : f32 to vector<8x1xf32>
    %50 = arith.addf %46, %49 : vector<8x1xf32>
    %51 = math.rsqrt %50 : vector<8x1xf32>
    %52 = vector.broadcast %51 : vector<8x1xf32> to vector<8x32xf32>
    %53 = arith.mulf %48, %52 : vector<8x32xf32>
    %54 = vector.broadcast %32 : vector<1x32xf32> to vector<8x32xf32>
    %55 = arith.mulf %53, %54 : vector<8x32xf32>
    %56 = vector.broadcast %33 : vector<1x32xf32> to vector<8x32xf32>
    %57 = arith.addf %55, %56 : vector<8x32xf32>
    %58 = arith.truncf %31 : vector<8x32xf32> to vector<8x32xbf16>
    %59 = arith.truncf %57 : vector<8x32xf32> to vector<8x32xbf16>
    %c0_25 = arith.constant 0 : index
    %c0_26 = arith.constant 0 : index
    %60 = vector.load %arg7[%c0_25, %c0_26] : memref<32x32xbf16, #tpu.memory_space<vmem>>, vector<32x32xbf16>
    %cst_27 = arith.constant dense<0.000000e+00> : vector<8x32xf32>
    %61 = tpu.matmul %58, %60, %cst_27 {dimension_numbers = #tpu.dot_dimension_numbers<[1], [0], [0], [1], [0, 0, 1, 1], [], []>} : vector<8x32xbf16>, vector<32x32xbf16>, vector<8x32xf32> -> vector<8x32xf32>
    %c0_28 = arith.constant 0 : index
    %c0_29 = arith.constant 0 : index
    %62 = vector.load %arg8[%c0_28, %c0_29] : memref<1x32xf32, #tpu.memory_space<vmem>>, vector<1x32xf32>
    %63 = vector.broadcast %62 : vector<1x32xf32> to vector<8x32xf32>
    %64 = arith.addf %61, %63 : vector<8x32xf32>
    %c0_30 = arith.constant 0 : index
    %c0_31 = arith.constant 0 : index
    %65 = vector.load %arg9[%c0_30, %c0_31] : memref<32x32xbf16, #tpu.memory_space<vmem>>, vector<32x32xbf16>
    %cst_32 = arith.constant dense<0.000000e+00> : vector<8x32xf32>
    %66 = tpu.matmul %59, %65, %cst_32 {dimension_numbers = #tpu.dot_dimension_numbers<[1], [0], [0], [1], [0, 0, 1, 1], [], []>} : vector<8x32xbf16>, vector<32x32xbf16>, vector<8x32xf32> -> vector<8x32xf32>
    %c0_33 = arith.constant 0 : index
    %c0_34 = arith.constant 0 : index
    %67 = vector.load %arg10[%c0_33, %c0_34] : memref<32x32xbf16, #tpu.memory_space<vmem>>, vector<32x32xbf16>
    %cst_35 = arith.constant dense<0.000000e+00> : vector<8x32xf32>
    %68 = tpu.matmul %59, %67, %cst_35 {dimension_numbers = #tpu.dot_dimension_numbers<[1], [0], [0], [1], [0, 0, 1, 1], [], []>} : vector<8x32xbf16>, vector<32x32xbf16>, vector<8x32xf32> -> vector<8x32xf32>
    %c0_36 = arith.constant 0 : index
    %c0_37 = arith.constant 0 : index
    %69 = vector.load %arg11[%c0_36, %c0_37] : memref<1x32xf32, #tpu.memory_space<vmem>>, vector<1x32xf32>
    %70 = vector.broadcast %69 : vector<1x32xf32> to vector<8x32xf32>
    %71 = arith.addf %68, %70 : vector<8x32xf32>
    %cst_38 = arith.constant 0.353553385 : f32
    %72 = vector.broadcast %cst_38 : f32 to vector<8x32xf32>
    %73 = arith.mulf %64, %72 : vector<8x32xf32>
    %74 = arith.truncf %73 : vector<8x32xf32> to vector<8x32xbf16>
    %75 = arith.truncf %66 : vector<8x32xf32> to vector<8x32xbf16>
    %76 = arith.truncf %71 : vector<8x32xf32> to vector<8x32xbf16>
    %77 = vector.extract_strided_slice %74 {offsets = [0, 0], sizes = [8, 8], strides = [1, 1]} : vector<8x32xbf16> to vector<8x8xbf16>
    %78 = vector.extract_strided_slice %75 {offsets = [0, 0], sizes = [8, 8], strides = [1, 1]} : vector<8x32xbf16> to vector<8x8xbf16>
    %cst_39 = arith.constant dense<0.000000e+00> : vector<8x8xf32>
    %79 = tpu.matmul %77, %78, %cst_39 {dimension_numbers = #tpu.dot_dimension_numbers<[1], [1], [0], [0], [0, 0, 1, 0], [], []>} : vector<8x8xbf16>, vector<8x8xbf16>, vector<8x8xf32> -> vector<8x8xf32>
    %80 = vector.broadcast %5 : vector<1x8xf32> to vector<8x8xf32>
    %81 = arith.addf %79, %80 : vector<8x8xf32>
    %cst_40 = arith.constant dense<0xFF800000> : vector<8xf32>
    %82 = vector.multi_reduction <maximumf>, %81, %cst_40 [1] : vector<8x8xf32> to vector<8xf32>
    %83 = vector.shape_cast %82 : vector<8xf32> to vector<8x1xf32>
    %84 = vector.broadcast %83 : vector<8x1xf32> to vector<8x8xf32>
    %85 = arith.subf %81, %84 : vector<8x8xf32>
    %86 = math.exp %85 : vector<8x8xf32>
    %cst_41 = arith.constant dense<0.000000e+00> : vector<8xf32>
    %87 = vector.multi_reduction <add>, %86, %cst_41 [1] : vector<8x8xf32> to vector<8xf32>
    %88 = vector.shape_cast %87 : vector<8xf32> to vector<8x1xf32>
    %89 = tpu.reciprocal %88 {approx = true} : vector<8x1xf32> -> vector<8x1xf32>
    %90 = vector.broadcast %89 : vector<8x1xf32> to vector<8x8xf32>
    %91 = arith.mulf %86, %90 : vector<8x8xf32>
    %92 = arith.truncf %91 : vector<8x8xf32> to vector<8x8xbf16>
    %93 = vector.extract_strided_slice %76 {offsets = [0, 0], sizes = [8, 8], strides = [1, 1]} : vector<8x32xbf16> to vector<8x8xbf16>
    %cst_42 = arith.constant dense<0.000000e+00> : vector<8x8xf32>
    %94 = tpu.matmul %92, %93, %cst_42 {dimension_numbers = #tpu.dot_dimension_numbers<[1], [0], [0], [1], [0, 0, 1, 1], [], []>} : vector<8x8xbf16>, vector<8x8xbf16>, vector<8x8xf32> -> vector<8x8xf32>
    %95 = vector.extract_strided_slice %74 {offsets = [0, 8], sizes = [8, 8], strides = [1, 1]} : vector<8x32xbf16> to vector<8x8xbf16>
    %96 = vector.extract_strided_slice %75 {offsets = [0, 8], sizes = [8, 8], strides = [1, 1]} : vector<8x32xbf16> to vector<8x8xbf16>
    %cst_43 = arith.constant dense<0.000000e+00> : vector<8x8xf32>
    %97 = tpu.matmul %95, %96, %cst_43 {dimension_numbers = #tpu.dot_dimension_numbers<[1], [1], [0], [0], [0, 0, 1, 0], [], []>} : vector<8x8xbf16>, vector<8x8xbf16>, vector<8x8xf32> -> vector<8x8xf32>
    %98 = vector.broadcast %5 : vector<1x8xf32> to vector<8x8xf32>
    %99 = arith.addf %97, %98 : vector<8x8xf32>
    %cst_44 = arith.constant dense<0xFF800000> : vector<8xf32>
    %100 = vector.multi_reduction <maximumf>, %99, %cst_44 [1] : vector<8x8xf32> to vector<8xf32>
    %101 = vector.shape_cast %100 : vector<8xf32> to vector<8x1xf32>
    %102 = vector.broadcast %101 : vector<8x1xf32> to vector<8x8xf32>
    %103 = arith.subf %99, %102 : vector<8x8xf32>
    %104 = math.exp %103 : vector<8x8xf32>
    %cst_45 = arith.constant dense<0.000000e+00> : vector<8xf32>
    %105 = vector.multi_reduction <add>, %104, %cst_45 [1] : vector<8x8xf32> to vector<8xf32>
    %106 = vector.shape_cast %105 : vector<8xf32> to vector<8x1xf32>
    %107 = tpu.reciprocal %106 {approx = true} : vector<8x1xf32> -> vector<8x1xf32>
    %108 = vector.broadcast %107 : vector<8x1xf32> to vector<8x8xf32>
    %109 = arith.mulf %104, %108 : vector<8x8xf32>
    %110 = arith.truncf %109 : vector<8x8xf32> to vector<8x8xbf16>
    %111 = vector.extract_strided_slice %76 {offsets = [0, 8], sizes = [8, 8], strides = [1, 1]} : vector<8x32xbf16> to vector<8x8xbf16>
    %cst_46 = arith.constant dense<0.000000e+00> : vector<8x8xf32>
    %112 = tpu.matmul %110, %111, %cst_46 {dimension_numbers = #tpu.dot_dimension_numbers<[1], [0], [0], [1], [0, 0, 1, 1], [], []>} : vector<8x8xbf16>, vector<8x8xbf16>, vector<8x8xf32> -> vector<8x8xf32>
    %113 = vector.extract_strided_slice %74 {offsets = [0, 16], sizes = [8, 8], strides = [1, 1]} : vector<8x32xbf16> to vector<8x8xbf16>
    %114 = vector.extract_strided_slice %75 {offsets = [0, 16], sizes = [8, 8], strides = [1, 1]} : vector<8x32xbf16> to vector<8x8xbf16>
    %cst_47 = arith.constant dense<0.000000e+00> : vector<8x8xf32>
    %115 = tpu.matmul %113, %114, %cst_47 {dimension_numbers = #tpu.dot_dimension_numbers<[1], [1], [0], [0], [0, 0, 1, 0], [], []>} : vector<8x8xbf16>, vector<8x8xbf16>, vector<8x8xf32> -> vector<8x8xf32>
    %116 = vector.broadcast %5 : vector<1x8xf32> to vector<8x8xf32>
    %117 = arith.addf %115, %116 : vector<8x8xf32>
    %cst_48 = arith.constant dense<0xFF800000> : vector<8xf32>
    %118 = vector.multi_reduction <maximumf>, %117, %cst_48 [1] : vector<8x8xf32> to vector<8xf32>
    %119 = vector.shape_cast %118 : vector<8xf32> to vector<8x1xf32>
    %120 = vector.broadcast %119 : vector<8x1xf32> to vector<8x8xf32>
    %121 = arith.subf %117, %120 : vector<8x8xf32>
    %122 = math.exp %121 : vector<8x8xf32>
    %cst_49 = arith.constant dense<0.000000e+00> : vector<8xf32>
    %123 = vector.multi_reduction <add>, %122, %cst_49 [1] : vector<8x8xf32> to vector<8xf32>
    %124 = vector.shape_cast %123 : vector<8xf32> to vector<8x1xf32>
    %125 = tpu.reciprocal %124 {approx = true} : vector<8x1xf32> -> vector<8x1xf32>
    %126 = vector.broadcast %125 : vector<8x1xf32> to vector<8x8xf32>
    %127 = arith.mulf %122, %126 : vector<8x8xf32>
    %128 = arith.truncf %127 : vector<8x8xf32> to vector<8x8xbf16>
    %129 = vector.extract_strided_slice %76 {offsets = [0, 16], sizes = [8, 8], strides = [1, 1]} : vector<8x32xbf16> to vector<8x8xbf16>
    %cst_50 = arith.constant dense<0.000000e+00> : vector<8x8xf32>
    %130 = tpu.matmul %128, %129, %cst_50 {dimension_numbers = #tpu.dot_dimension_numbers<[1], [0], [0], [1], [0, 0, 1, 1], [], []>} : vector<8x8xbf16>, vector<8x8xbf16>, vector<8x8xf32> -> vector<8x8xf32>
    %131 = vector.extract_strided_slice %74 {offsets = [0, 24], sizes = [8, 8], strides = [1, 1]} : vector<8x32xbf16> to vector<8x8xbf16>
    %132 = vector.extract_strided_slice %75 {offsets = [0, 24], sizes = [8, 8], strides = [1, 1]} : vector<8x32xbf16> to vector<8x8xbf16>
    %cst_51 = arith.constant dense<0.000000e+00> : vector<8x8xf32>
    %133 = tpu.matmul %131, %132, %cst_51 {dimension_numbers = #tpu.dot_dimension_numbers<[1], [1], [0], [0], [0, 0, 1, 0], [], []>} : vector<8x8xbf16>, vector<8x8xbf16>, vector<8x8xf32> -> vector<8x8xf32>
    %134 = vector.broadcast %5 : vector<1x8xf32> to vector<8x8xf32>
    %135 = arith.addf %133, %134 : vector<8x8xf32>
    %cst_52 = arith.constant dense<0xFF800000> : vector<8xf32>
    %136 = vector.multi_reduction <maximumf>, %135, %cst_52 [1] : vector<8x8xf32> to vector<8xf32>
    %137 = vector.shape_cast %136 : vector<8xf32> to vector<8x1xf32>
    %138 = vector.broadcast %137 : vector<8x1xf32> to vector<8x8xf32>
    %139 = arith.subf %135, %138 : vector<8x8xf32>
    %140 = math.exp %139 : vector<8x8xf32>
    %cst_53 = arith.constant dense<0.000000e+00> : vector<8xf32>
    %141 = vector.multi_reduction <add>, %140, %cst_53 [1] : vector<8x8xf32> to vector<8xf32>
    %142 = vector.shape_cast %141 : vector<8xf32> to vector<8x1xf32>
    %143 = tpu.reciprocal %142 {approx = true} : vector<8x1xf32> -> vector<8x1xf32>
    %144 = vector.broadcast %143 : vector<8x1xf32> to vector<8x8xf32>
    %145 = arith.mulf %140, %144 : vector<8x8xf32>
    %146 = arith.truncf %145 : vector<8x8xf32> to vector<8x8xbf16>
    %147 = vector.extract_strided_slice %76 {offsets = [0, 24], sizes = [8, 8], strides = [1, 1]} : vector<8x32xbf16> to vector<8x8xbf16>
    %cst_54 = arith.constant dense<0.000000e+00> : vector<8x8xf32>
    %148 = tpu.matmul %146, %147, %cst_54 {dimension_numbers = #tpu.dot_dimension_numbers<[1], [0], [0], [1], [0, 0, 1, 1], [], []>} : vector<8x8xbf16>, vector<8x8xbf16>, vector<8x8xf32> -> vector<8x8xf32>
    %149 = tpu.concatenate %94, %112, %130, %148 in 1 : vector<8x8xf32>, vector<8x8xf32>, vector<8x8xf32>, vector<8x8xf32> -> vector<8x32xf32>
    %150 = arith.truncf %149 : vector<8x32xf32> to vector<8x32xbf16>
    %c0_55 = arith.constant 0 : index
    %c0_56 = arith.constant 0 : index
    %151 = vector.load %arg12[%c0_55, %c0_56] : memref<32x32xbf16, #tpu.memory_space<vmem>>, vector<32x32xbf16>
    %cst_57 = arith.constant dense<0.000000e+00> : vector<8x32xf32>
    %152 = tpu.matmul %150, %151, %cst_57 {dimension_numbers = #tpu.dot_dimension_numbers<[1], [0], [0], [1], [0, 0, 1, 1], [], []>} : vector<8x32xbf16>, vector<32x32xbf16>, vector<8x32xf32> -> vector<8x32xf32>
    %c0_58 = arith.constant 0 : index
    %c0_59 = arith.constant 0 : index
    %153 = vector.load %arg13[%c0_58, %c0_59] : memref<1x32xf32, #tpu.memory_space<vmem>>, vector<1x32xf32>
    %154 = vector.broadcast %153 : vector<1x32xf32> to vector<8x32xf32>
    %155 = arith.addf %152, %154 : vector<8x32xf32>
    %156 = arith.addf %155, %1 : vector<8x32xf32>
    %c0_60 = arith.constant 0 : index
    %c0_61 = arith.constant 0 : index
    %157 = vector.load %arg14[%c0_60, %c0_61] : memref<1x32xf32, #tpu.memory_space<vmem>>, vector<1x32xf32>
    %c0_62 = arith.constant 0 : index
    %c0_63 = arith.constant 0 : index
    %158 = vector.load %arg15[%c0_62, %c0_63] : memref<1x32xf32, #tpu.memory_space<vmem>>, vector<1x32xf32>
    %cst_64 = arith.constant dense<0.000000e+00> : vector<8xf32>
    %159 = vector.multi_reduction <add>, %156, %cst_64 [1] : vector<8x32xf32> to vector<8xf32>
    %160 = vector.shape_cast %159 : vector<8xf32> to vector<8x1xf32>
    %cst_65 = arith.constant 3.200000e+01 : f32
    %161 = vector.broadcast %cst_65 : f32 to vector<8x1xf32>
    %162 = arith.divf %160, %161 : vector<8x1xf32>
    %163 = vector.broadcast %162 : vector<8x1xf32> to vector<8x32xf32>
    %164 = arith.subf %156, %163 : vector<8x32xf32>
    %165 = vector.broadcast %162 : vector<8x1xf32> to vector<8x32xf32>
    %166 = arith.subf %156, %165 : vector<8x32xf32>
    %167 = arith.mulf %164, %166 : vector<8x32xf32>
    %cst_66 = arith.constant dense<0.000000e+00> : vector<8xf32>
    %168 = vector.multi_reduction <add>, %167, %cst_66 [1] : vector<8x32xf32> to vector<8xf32>
    %169 = vector.shape_cast %168 : vector<8xf32> to vector<8x1xf32>
    %cst_67 = arith.constant 3.200000e+01 : f32
    %170 = vector.broadcast %cst_67 : f32 to vector<8x1xf32>
    %171 = arith.divf %169, %170 : vector<8x1xf32>
    %172 = vector.broadcast %162 : vector<8x1xf32> to vector<8x32xf32>
    %173 = arith.subf %156, %172 : vector<8x32xf32>
    %cst_68 = arith.constant 9.99999997E-7 : f32
    %174 = vector.broadcast %cst_68 : f32 to vector<8x1xf32>
    %175 = arith.addf %171, %174 : vector<8x1xf32>
    %176 = math.rsqrt %175 : vector<8x1xf32>
    %177 = vector.broadcast %176 : vector<8x1xf32> to vector<8x32xf32>
    %178 = arith.mulf %173, %177 : vector<8x32xf32>
    %179 = vector.broadcast %157 : vector<1x32xf32> to vector<8x32xf32>
    %180 = arith.mulf %178, %179 : vector<8x32xf32>
    %181 = vector.broadcast %158 : vector<1x32xf32> to vector<8x32xf32>
    %182 = arith.addf %180, %181 : vector<8x32xf32>
    %183 = arith.truncf %182 : vector<8x32xf32> to vector<8x32xbf16>
    %c0_69 = arith.constant 0 : index
    %c0_70 = arith.constant 0 : index
    %184 = vector.load %arg16[%c0_69, %c0_70] : memref<32x64xbf16, #tpu.memory_space<vmem>>, vector<32x64xbf16>
    %cst_71 = arith.constant dense<0.000000e+00> : vector<8x64xf32>
    %185 = tpu.matmul %183, %184, %cst_71 {dimension_numbers = #tpu.dot_dimension_numbers<[1], [0], [0], [1], [0, 0, 1, 1], [], []>} : vector<8x32xbf16>, vector<32x64xbf16>, vector<8x64xf32> -> vector<8x64xf32>
    %c0_72 = arith.constant 0 : index
    %c0_73 = arith.constant 0 : index
    %186 = vector.load %arg17[%c0_72, %c0_73] : memref<1x64xf32, #tpu.memory_space<vmem>>, vector<1x64xf32>
    %187 = vector.broadcast %186 : vector<1x64xf32> to vector<8x64xf32>
    %188 = arith.addf %185, %187 : vector<8x64xf32>
    %cst_74 = arith.constant 5.000000e-01 : f32
    %189 = vector.broadcast %cst_74 : f32 to vector<8x64xf32>
    %190 = arith.mulf %189, %188 : vector<8x64xf32>
    %cst_75 = arith.constant 4.471500e-02 : f32
    %191 = vector.broadcast %cst_75 : f32 to vector<8x64xf32>
    %192 = arith.mulf %191, %188 : vector<8x64xf32>
    %193 = arith.mulf %192, %188 : vector<8x64xf32>
    %194 = arith.mulf %193, %188 : vector<8x64xf32>
    %195 = arith.addf %188, %194 : vector<8x64xf32>
    %cst_76 = arith.constant 0.797884583 : f32
    %196 = vector.broadcast %cst_76 : f32 to vector<8x64xf32>
    %197 = arith.mulf %196, %195 : vector<8x64xf32>
    %198 = math.tanh %197 : vector<8x64xf32>
    %cst_77 = arith.constant 1.000000e+00 : f32
    %199 = vector.broadcast %cst_77 : f32 to vector<8x64xf32>
    %200 = arith.addf %199, %198 : vector<8x64xf32>
    %201 = arith.mulf %190, %200 : vector<8x64xf32>
    %202 = arith.truncf %201 : vector<8x64xf32> to vector<8x64xbf16>
    %c0_78 = arith.constant 0 : index
    %c0_79 = arith.constant 0 : index
    %203 = vector.load %arg18[%c0_78, %c0_79] : memref<64x32xbf16, #tpu.memory_space<vmem>>, vector<64x32xbf16>
    %cst_80 = arith.constant dense<0.000000e+00> : vector<8x32xf32>
    %204 = tpu.matmul %202, %203, %cst_80 {dimension_numbers = #tpu.dot_dimension_numbers<[1], [0], [0], [1], [0, 0, 1, 1], [], []>} : vector<8x64xbf16>, vector<64x32xbf16>, vector<8x32xf32> -> vector<8x32xf32>
    %c0_81 = arith.constant 0 : index
    %c0_82 = arith.constant 0 : index
    %205 = vector.load %arg19[%c0_81, %c0_82] : memref<1x32xf32, #tpu.memory_space<vmem>>, vector<1x32xf32>
    %206 = vector.broadcast %205 : vector<1x32xf32> to vector<8x32xf32>
    %207 = arith.addf %204, %206 : vector<8x32xf32>
    %208 = arith.addf %207, %156 : vector<8x32xf32>
    %c0_83 = arith.constant 0 : index
    %c0_84 = arith.constant 0 : index
    %c0_85 = arith.constant 0 : index
    %209 = vector.load %arg20[%c0_83, %c0_84, %c0_85] : memref<1x8x32xf32, #tpu.memory_space<vmem>>, vector<1x8x32xf32>
    %210 = vector.shape_cast %209 : vector<1x8x32xf32> to vector<8x32xf32>
    %211 = vector.shape_cast %208 : vector<8x32xf32> to vector<1x8x32xf32>
    tpu.vector_store %arg20[%c0_83, %c0_84, %c0_85], %211 {strides = array<i32>} : memref<1x8x32xf32, #tpu.memory_space<vmem>>, vector<1x8x32xf32>,
    return
  }
  func.func @transform_0(%arg0: i32, %arg1: i32) -> (i32, i32, i32) {
    %c0_i32 = arith.constant 0 : i32
    %c0_i32_0 = arith.constant 0 : i32
    return %arg0, %arg1, %c0_i32 : i32, i32, i32
  }
  func.func @transform_1(%arg0: i32, %arg1: i32) -> (i32, i32, i32) {
    %c0_i32 = arith.constant 0 : i32
    %c0_i32_0 = arith.constant 0 : i32
    %c0_i32_1 = arith.constant 0 : i32
    return %arg0, %c0_i32, %c0_i32_0 : i32, i32, i32
  }
  func.func @transform_2(%arg0: i32, %arg1: i32) -> (i32, i32, i32) {
    %c0_i32 = arith.constant 0 : i32
    %c0_i32_0 = arith.constant 0 : i32
    %c0_i32_1 = arith.constant 0 : i32
    return %arg0, %c0_i32, %c0_i32_0 : i32, i32, i32
  }
  func.func @transform_3(%arg0: i32, %arg1: i32) -> (i32, i32) {
    %c0_i32 = arith.constant 0 : i32
    %c0_i32_0 = arith.constant 0 : i32
    %c0_i32_1 = arith.constant 0 : i32
    return %c0_i32, %c0_i32_0 : i32, i32
  }
  func.func @transform_4(%arg0: i32, %arg1: i32) -> (i32, i32) {
    %c0_i32 = arith.constant 0 : i32
    %c0_i32_0 = arith.constant 0 : i32
    %c0_i32_1 = arith.constant 0 : i32
    return %c0_i32, %c0_i32_0 : i32, i32
  }
  func.func @transform_5(%arg0: i32, %arg1: i32) -> (i32, i32) {
    %c0_i32 = arith.constant 0 : i32
    %c0_i32_0 = arith.constant 0 : i32
    %c0_i32_1 = arith.constant 0 : i32
    return %c0_i32, %c0_i32_0 : i32, i32
  }
  func.func @transform_6(%arg0: i32, %arg1: i32) -> (i32, i32) {
    %c0_i32 = arith.constant 0 : i32
    %c0_i32_0 = arith.constant 0 : i32
    %c0_i32_1 = arith.constant 0 : i32
    return %c0_i32, %c0_i32_0 : i32, i32
  }
  func.func @transform_7(%arg0: i32, %arg1: i32) -> (i32, i32) {
    %c0_i32 = arith.constant 0 : i32
    %c0_i32_0 = arith.constant 0 : i32
    %c0_i32_1 = arith.constant 0 : i32
    return %c0_i32, %c0_i32_0 : i32, i32
  }
  func.func @transform_8(%arg0: i32, %arg1: i32) -> (i32, i32) {
    %c0_i32 = arith.constant 0 : i32
    %c0_i32_0 = arith.constant 0 : i32
    %c0_i32_1 = arith.constant 0 : i32
    return %c0_i32, %c0_i32_0 : i32, i32
  }
  func.func @transform_9(%arg0: i32, %arg1: i32) -> (i32, i32) {
    %c0_i32 = arith.constant 0 : i32
    %c0_i32_0 = arith.constant 0 : i32
    %c0_i32_1 = arith.constant 0 : i32
    return %c0_i32, %c0_i32_0 : i32, i32
  }
  func.func @transform_10(%arg0: i32, %arg1: i32) -> (i32, i32) {
    %c0_i32 = arith.constant 0 : i32
    %c0_i32_0 = arith.constant 0 : i32
    %c0_i32_1 = arith.constant 0 : i32
    return %c0_i32, %c0_i32_0 : i32, i32
  }
  func.func @transform_11(%arg0: i32, %arg1: i32) -> (i32, i32) {
    %c0_i32 = arith.constant 0 : i32
    %c0_i32_0 = arith.constant 0 : i32
    %c0_i32_1 = arith.constant 0 : i32
    return %c0_i32, %c0_i32_0 : i32, i32
  }
  func.func @transform_12(%arg0: i32, %arg1: i32) -> (i32, i32) {
    %c0_i32 = arith.constant 0 : i32
    %c0_i32_0 = arith.constant 0 : i32
    %c0_i32_1 = arith.constant 0 : i32
    return %c0_i32, %c0_i32_0 : i32, i32
  }
  func.func @transform_13(%arg0: i32, %arg1: i32) -> (i32, i32) {
    %c0_i32 = arith.constant 0 : i32
    %c0_i32_0 = arith.constant 0 : i32
    %c0_i32_1 = arith.constant 0 : i32
    return %c0_i32, %c0_i32_0 : i32, i32
  }
  func.func @transform_14(%arg0: i32, %arg1: i32) -> (i32, i32) {
    %c0_i32 = arith.constant 0 : i32
    %c0_i32_0 = arith.constant 0 : i32
    %c0_i32_1 = arith.constant 0 : i32
    return %c0_i32, %c0_i32_0 : i32, i32
  }
  func.func @transform_15(%arg0: i32, %arg1: i32) -> (i32, i32) {
    %c0_i32 = arith.constant 0 : i32
    %c0_i32_0 = arith.constant 0 : i32
    %c0_i32_1 = arith.constant 0 : i32
    return %c0_i32, %c0_i32_0 : i32, i32
  }
  func.func @transform_16(%arg0: i32, %arg1: i32) -> (i32, i32) {
    %c0_i32 = arith.constant 0 : i32
    %c0_i32_0 = arith.constant 0 : i32
    %c0_i32_1 = arith.constant 0 : i32
    return %c0_i32, %c0_i32_0 : i32, i32
  }
  func.func @transform_17(%arg0: i32, %arg1: i32) -> (i32, i32) {
    %c0_i32 = arith.constant 0 : i32
    %c0_i32_0 = arith.constant 0 : i32
    %c0_i32_1 = arith.constant 0 : i32
    return %c0_i32, %c0_i32_0 : i32, i32
  }
  func.func @transform_18(%arg0: i32, %arg1: i32) -> (i32, i32, i32) {
    %c0_i32 = arith.constant 0 : i32
    %c0_i32_0 = arith.constant 0 : i32
    return %arg0, %arg1, %c0_i32 : i32, i32, i32
  }
}

</mosaic_0001>

<bundles_post_ra>
// kernel: tpu_custom_call.1
= control target key start
LH: loop header
LB: loop body
LE: loop exit
PB: predicated region body
PF: predicated region fallthrough
CT: control target
= control target key end

     0   :  { %s3309_s0 = inlined_call_operand.vmem [shape: f32[2,8,32], index: 0, kind: input, shape index: {}]   ;;  %s3310_s1 = inlined_call_operand.vmem [shape: f32[2,8,32], index: 1, kind: input, shape index: {}]   ;;  %s3311_s2 = inlined_call_operand.hbm [shape: f32[2,1,8], index: 2, kind: input, shape index: {}]   ;;  %s3312_s3 = inlined_call_operand.vmem [shape: f32[1,32], index: 3, kind: input, shape index: {}]   ;;  %s3313_s4 = inlined_call_operand.hbm [shape: f32[1,32], index: 4, kind: input, shape index: {}]   ;;  %s3314_s5 = inlined_call_operand.vmem [shape: bf16[32,32], index: 5, kind: input, shape index: {}]   ;;  %s3315_s6 = inlined_call_operand.hbm [shape: f32[1,32], index: 6, kind: input, shape index: {}]   ;;  %s3316_s7 = inlined_call_operand.hbm [shape: bf16[32,32], index: 7, kind: input, shape index: {}]   ;;  %s3317_s8 = inlined_call_operand.hbm [shape: bf16[32,32], index: 8, kind: input, shape index: {}]   ;;  %s3318_s9 = inlined_call_operand.hbm [shape: f32[1,32], index: 9, kind: input, shape index: {}]   ;;  %s3319_s10 = inlined_call_operand.vmem [shape: bf16[32,32], index: 10, kind: input, shape index: {}]   ;;  %s3320_s11 = inlined_call_operand.hbm [shape: f32[1,32], index: 11, kind: input, shape index: {}]   ;;  %s3321_s12 = inlined_call_operand.hbm [shape: f32[1,32], index: 12, kind: input, shape index: {}]   ;;  %s3322_s13 = inlined_call_operand.hbm [shape: f32[1,32], index: 13, kind: input, shape index: {}]   ;;  %s3323_s14 = inlined_call_operand.vmem [shape: bf16[32,64], index: 14, kind: input, shape index: {}]   ;;  %s3324_s15 = inlined_call_operand.vmem [shape: f32[1,64], index: 15, kind: input, shape index: {}]   ;;  %s3325_s16 = inlined_call_operand.vmem [shape: bf16[64,32], index: 16, kind: input, shape index: {}]   ;;  %s3326_s17 = inlined_call_operand.vmem [shape: f32[1,32], index: 17, kind: input, shape index: {}]   ;;  %s3327_s18 = inlined_call_operand.hbm [shape: f32[2,8,32], index: 18, kind: output, shape index: {}]  }
   0x1   :  { %3340 = sst [smem:[#allocation24_spill]] %s3309_s0 }
   0x2   :  { %3341 = sst [smem:[#allocation25_spill]] %s3310_s1 }
   0x3   :  { %3342 = sst [smem:[#allocation26_spill]] %s3311_s2 }
   0x4   :  { %3343 = sst [smem:[#allocation27_spill]] %s3312_s3 }
   0x5   :  { %3344 = sst [smem:[#allocation28_spill]] %s3313_s4 }
   0x6   :  { %3345 = sst [smem:[#allocation29_spill]] %s3314_s5 }
   0x7   :  { %3346 = sst [smem:[#allocation30_spill]] %s3315_s6 }
   0x8   :  { %3347 = sst [smem:[#allocation31_spill]] %s3316_s7 }
   0x9   :  { %3348 = sst [smem:[#allocation32_spill]] %s3319_s10 }
   0xa   :  { %3349 = sst [smem:[#allocation33_spill]] %s3323_s14 }
   0xb   :  { %3350 = sst [smem:[#allocation34_spill]] %s3324_s15 }
   0xc   :  { %3351 = sst [smem:[#allocation35_spill]] %s3325_s16 }
   0xd   :  { %3352 = sst [smem:[#allocation36_spill]] %s3326_s17 }
   0xe   :  { %3353 = sst [smem:[#allocation37_spill]] %s3327_s18 }
   0xf   :  { %23 = vsyncpa [#allocation3], 0 }
  0x10   :  { %25 = vsyncpa [#allocation3 + $0x1], 0 }
  0x11   :  { %26 = vsyncpa [#allocation6], 0 }
  0x12   :  { %27 = vsyncpa [#allocation9], 0 }
  0x13   :  { %28 = vsyncpa [#allocation12], 0 }
  0x14   :  { %29 = vsyncpa [#allocation15], 0 }
  0x15   :  { %30 = vsyncpa [#allocation4], 0 }
  0x16   :  { %32 = vsyncpa [#allocation4 + $0x1], 0  ;;  %s2773_s27 = smov 0   ;;  %s2775_s28 = smov 0  }
  0x17   :  { %s2777_s29 = smov 0   ;;  %s2779_s30 = smov 0  }
  0x18   :  { %s2781_s0 = smov 0   ;;  %s2783_s19 = smov 0  }
  0x19 LB: > { %s3329_s1 = sadd.s32 4294967295, %s2656_s19   ;;  %p1912_p0 = scmp.ge.s32.totalorder %s2656_s19, 1  ;;  %s2656_s19 = sphi %s2783_s19, %s38_s19   ;;  %s2652_s0 = sphi %s2781_s0, %s3390_s0   ;;  %s2648_s30 = sphi %s2779_s30, %s3389_s30   ;;  %s2644_s29 = sphi %s2777_s29, %s3388_s29   ;;  %s2640_s28 = sphi %s2775_s28, %s3387_s28   ;;  %s2636_s27 = sphi %s2773_s27, %s3386_s27  }
  0x1a   : > { %p2807_p1 = scmp.eq.s32.totalorder %s3329_s1, 0  ;;  %p478_p2 = scmp.lt.s32.totalorder %s2656_s19, 3 }
  0x1b   : > { %s2658_s22 = smov [#allocation5]   ;;  %s2659_s23 = smov [#allocation8]  }
  0x1c   : > { %s3354_s20 = scalar_select %p2807_p1, 1, 0 }
  0x1d   : > { %p2812_p3 = pnand %p1912_p0, %p478_p2  ;;  %s494_s2 = sshll.u32 %s2658_s22, 4  ;;  %s495_s2 = int_to_ptr.vmem [resolvable:$true] %s494_s2 }
  0x1e   : > { %s518_s24 = sshll.u32 %s2659_s23, 4  ;;  %s2660_s26 = smov [#allocation11]   ;;  %s2825_s24 = int_to_ptr.vmem [resolvable:$true] %s518_s24 }
  0x1f   : > { %s3355_s21 = scalar_select %p2812_p3, 1, 0 }
  0x20   : > { %p2149_p5 = pneg %p2812_p3  ;;  %s2827_s1 = sshll.u32 %s2660_s26, 4  ;;  %s546_s1 = int_to_ptr.vmem [resolvable:$true] %s2827_s1 }
  0x21   : > { %s3357_s4 = sld [smem:[#allocation28_spill]] }
  0x22   : > { %p2821_p6 = pnand %p2149_p5, %p2807_p1 }
  0x24   : > { %p2837_p8 = pneg %p2821_p6 }
  0x27   : > { %s2304_s22 = scalar_lea.hbm %s3357_s4, 16 }
  0x28   : > { %p2305_p7 = scmp.ne.s32.totalorder %s3357_s4, %s2304_s22  ;;  %p2311_p11 = scmp.lt.u32.totalorder %s2304_s22, %s3357_s4 }
  0x2a   : > { %p2307_p9 = pnand %p2837_p8, %p2305_p7 }
  0x2c   : > { %p2308_p10 = pneg %p2307_p9 }
  0x2e   : > { %p2313_p12 = pnand %p2311_p11, %p2308_p10 }
  0x30   : > { %2316 = shalt.err (!%p2313_p12)
}
  0x31   : > { %s2317_s17 = scalar_lea.vmem %s495_s2, 16  ;;  %s2324_s15 = scalar_lea.vmem %s495_s2, 32 }
  0x32   : > { %p2318_p13 = scmp.ne.s32.totalorder %s495_s2, %s2317_s17  ;;  %p2325_p5 = scmp.lt.s32.totalorder %s495_s2, %s495_s2 }
  0x33   : > { %p2326_p4 = scmp.lt.s32.totalorder %s2324_s15, %s2317_s17 }
  0x34   : > { %p2320_p0 = pnand %p2318_p13, %p2837_p8 }
  0x35   : > { %p2327_p3 = por %p2326_p4, %p2325_p5 }
  0x36   : > { %p2321_p2 = pneg %p2320_p0 }
  0x38   : > { %p2328_p1 = pnand %p2327_p3, %p2321_p2 }
  0x3a   : > { %2331 = shalt.err (!%p2328_p1)
}
  0x3b   : > { %2152 = dma.hbm_to_vmem [thread:$0]  (!%p2821_p6), %s3357_s4, 16, %s495_s2, [#allocation6]  }
  0x3c   : > { %s3359_s7 = sld [smem:[#allocation31_spill]] }
  0x42   : > { %s2332_s26 = scalar_lea.hbm %s3359_s7, 256 }
  0x43   : > { %p2333_p7 = scmp.ne.s32.totalorder %s3359_s7, %s2332_s26  ;;  %p2339_p1 = scmp.lt.u32.totalorder %s2332_s26, %s3359_s7 }
  0x45   : > { %p2335_p9 = pnand %p2333_p7, %p2837_p8 }
  0x47   : > { %p2336_p4 = pneg %p2335_p9 }
  0x49   : > { %p2341_p3 = pnand %p2339_p1, %p2336_p4 }
  0x4b   : > { %2344 = shalt.err (!%p2341_p3)
}
  0x4c   : > { %s2345_s2 = scalar_lea.vmem %s2825_s24, 256  ;;  %p2353_p13 = scmp.lt.s32.totalorder %s2825_s24, %s2825_s24 }
  0x4d   : > { %p2346_p10 = scmp.ne.s32.totalorder %s2825_s24, %s2345_s2  ;;  %p2354_p0 = scmp.lt.s32.totalorder %s2345_s2, %s2345_s2 }
  0x4f   : > { %p2348_p11 = pnand %p2346_p10, %p2837_p8  ;;  %p2355_p2 = por %p2354_p0, %p2353_p13 }
  0x51   : > { %p2349_p12 = pneg %p2348_p11 }
  0x53   : > { %p2356_p5 = pnand %p2355_p2, %p2349_p12 }
  0x55   : > { %2359 = shalt.err (!%p2356_p5)
}
  0x56   : > { %s3337_s3 = smov 64   ;;  %s3338_s10 = smov 4  }
  0x57   : > { %2158 = dma.hbm_to_vmem [thread:$0]  (!%p2821_p6), %s3359_s7, 256, %s2825_s24, [#allocation9], %s3337_s3, %s3337_s3, %s3338_s10  }
  0x58   : > { %s2360_s26 = scalar_lea.hbm %s3318_s9, 16 }
  0x59   : > { %p2361_p7 = scmp.ne.s32.totalorder %s3318_s9, %s2360_s26  ;;  %p2367_p1 = scmp.lt.u32.totalorder %s2360_s26, %s3318_s9 }
  0x5b   : > { %p2363_p9 = pnand %p2361_p7, %p2837_p8 }
  0x5d   : > { %p2364_p4 = pneg %p2363_p9 }
  0x5f   : > { %p2369_p3 = pnand %p2367_p1, %p2364_p4 }
  0x61   : > { %2372 = shalt.err (!%p2369_p3)
}
  0x62   : > { %s2373_s16 = scalar_lea.vmem %s546_s1, 16  ;;  %s2380_s24 = scalar_lea.vmem %s546_s1, 32 }
  0x63   : > { %p2374_p10 = scmp.ne.s32.totalorder %s546_s1, %s2373_s16  ;;  %p2381_p13 = scmp.lt.s32.totalorder %s546_s1, %s546_s1 }
  0x64   : > { %p2382_p0 = scmp.lt.s32.totalorder %s2380_s24, %s2373_s16 }
  0x65   : > { %p2376_p11 = pnand %p2374_p10, %p2837_p8 }
  0x66   : > { %p2383_p2 = por %p2382_p0, %p2381_p13 }
  0x67   : > { %p2377_p12 = pneg %p2376_p11 }
  0x69   : > { %p2384_p5 = pnand %p2383_p2, %p2377_p12 }
  0x6b   : > { %2387 = shalt.err (!%p2384_p5)
}
  0x6c   : > { %2164 = dma.hbm_to_vmem [thread:$0]  (!%p2821_p6), %s3318_s9, 16, %s546_s1, [#allocation12]  }
  0x6d   : > { %s2663_s4 = smov [#allocation14]   ;;  %s2664_s26 = smov [#allocation7]  }
  0x6e   : > { %s570_s22 = sshll.u32 %s2663_s4, 4  ;;  %s508_s17 = sshll.u32 %s2664_s26, 4  ;;  %s571_s22 = int_to_ptr.vmem [resolvable:$true] %s570_s22  ;;  %s509_s17 = int_to_ptr.vmem [resolvable:$true] %s508_s17 }
  0x6f   : > { %s2388_s3 = scalar_lea.hbm %s3321_s12, 16 }
  0x70   : > { %p2389_p7 = scmp.ne.s32.totalorder %s3321_s12, %s2388_s3  ;;  %p2395_p1 = scmp.lt.u32.totalorder %s2388_s3, %s3321_s12 }
  0x72   : > { %p2391_p9 = pnand %p2389_p7, %p2837_p8 }
  0x74   : > { %p2392_p4 = pneg %p2391_p9 }
  0x76   : > { %p2397_p3 = pnand %p2395_p1, %p2392_p4 }
  0x78   : > { %2400 = shalt.err (!%p2397_p3)
}
  0x79   : > { %s2401_s1 = scalar_lea.vmem %s571_s22, 16  ;;  %s2408_s14 = scalar_lea.vmem %s571_s22, 32 }
  0x7a   : > { %p2402_p10 = scmp.ne.s32.totalorder %s571_s22, %s2401_s1  ;;  %p2409_p13 = scmp.lt.s32.totalorder %s571_s22, %s571_s22 }
  0x7b   : > { %p2410_p0 = scmp.lt.s32.totalorder %s2408_s14, %s2401_s1 }
  0x7c   : > { %p2404_p11 = pnand %p2402_p10, %p2837_p8 }
  0x7d   : > { %p2411_p2 = por %p2410_p0, %p2409_p13 }
  0x7e   : > { %p2405_p12 = pneg %p2404_p11 }
  0x80   : > { %p2412_p5 = pnand %p2411_p2, %p2405_p12 }
  0x82   : > { %2415 = shalt.err (!%p2412_p5)
}
  0x83   : > { %2170 = dma.hbm_to_vmem [thread:$0]  (!%p2821_p6), %s3321_s12, 16, %s571_s22, [#allocation15]  }
  0x84   : > { %s3360_s6 = sld [smem:[#allocation30_spill]] }
  0x8a   : > { %s2416_s15 = scalar_lea.hbm %s3360_s6, 16 }
  0x8b   : > { %p2417_p7 = scmp.ne.s32.totalorder %s3360_s6, %s2416_s15  ;;  %p2423_p1 = scmp.lt.u32.totalorder %s2416_s15, %s3360_s6 }
  0x8d   : > { %p2419_p9 = pnand %p2417_p7, %p2837_p8 }
  0x8f   : > { %p2420_p4 = pneg %p2419_p9 }
  0x91   : > { %p2425_p3 = pnand %p2423_p1, %p2420_p4 }
  0x93   : > { %2428 = shalt.err (!%p2425_p3)
}
  0x94   : > { %s2429_s1 = scalar_lea.vmem %s509_s17, 16  ;;  %s2436_s22 = scalar_lea.vmem %s509_s17, 32 }
  0x95   : > { %p2430_p10 = scmp.ne.s32.totalorder %s509_s17, %s2429_s1  ;;  %p2437_p13 = scmp.lt.s32.totalorder %s509_s17, %s509_s17 }
  0x96   : > { %p2438_p0 = scmp.lt.s32.totalorder %s2436_s22, %s2429_s1 }
  0x97   : > { %p2432_p11 = pnand %p2430_p10, %p2837_p8 }
  0x98   : > { %p2439_p2 = por %p2438_p0, %p2437_p13 }
  0x99   : > { %p2433_p12 = pneg %p2432_p11 }
  0x9b   : > { %p2440_p5 = pnand %p2439_p2, %p2433_p12 }
  0x9d   : > { %2443 = shalt.err (!%p2440_p5)
}
  0x9e   : > { %2155 = dma.hbm_to_vmem [thread:$0]  (!%p2821_p6), %s3360_s6, 16, %s509_s17, [#allocation6]  }
  0x9f   : > { %s2665_s26 = smov [#allocation10]   ;;  %s2666_s10 = smov [#allocation13]  }
  0xa0   : > { %s531_s3 = sshll.u32 %s2665_s26, 4  ;;  %s559_s15 = sshll.u32 %s2666_s10, 4  ;;  %s532_s3 = int_to_ptr.vmem [resolvable:$true] %s531_s3  ;;  %s560_s15 = int_to_ptr.vmem [resolvable:$true] %s559_s15 }
  0xa1   : > { %s2444_s24 = scalar_lea.hbm %s3317_s8, 256 }
  0xa2   : > { %p2445_p7 = scmp.ne.s32.totalorder %s3317_s8, %s2444_s24  ;;  %p2451_p1 = scmp.lt.u32.totalorder %s2444_s24, %s3317_s8 }
  0xa4   : > { %p2447_p9 = pnand %p2445_p7, %p2837_p8 }
  0xa6   : > { %p2448_p4 = pneg %p2447_p9 }
  0xa8   : > { %p2453_p3 = pnand %p2451_p1, %p2448_p4 }
  0xaa   : > { %2456 = shalt.err (!%p2453_p3)
}
  0xab   : > { %s2457_s17 = scalar_lea.vmem %s532_s3, 256  ;;  %p2465_p13 = scmp.lt.s32.totalorder %s532_s3, %s532_s3 }
  0xac   : > { %p2458_p10 = scmp.ne.s32.totalorder %s532_s3, %s2457_s17  ;;  %p2466_p0 = scmp.lt.s32.totalorder %s2457_s17, %s2457_s17 }
  0xae   : > { %p2460_p11 = pnand %p2458_p10, %p2837_p8  ;;  %p2467_p2 = por %p2466_p0, %p2465_p13 }
  0xb0   : > { %p2461_p12 = pneg %p2460_p11 }
  0xb2   : > { %p2468_p5 = pnand %p2467_p2, %p2461_p12 }
  0xb4   : > { %2471 = shalt.err (!%p2468_p5)
}
  0xb5   : > { %s3361_s4 = smov 4   ;;  %s3362_s26 = smov 64  }
  0xb6   : > { %2161 = dma.hbm_to_vmem [thread:$0]  (!%p2821_p6), %s3317_s8, 256, %s532_s3, [#allocation9], %s3362_s26, %s3362_s26, %s3361_s4  }
  0xb7   : > { %s2472_s18 = scalar_lea.hbm %s3320_s11, 16 }
  0xb8   : > { %p2473_p7 = scmp.ne.s32.totalorder %s3320_s11, %s2472_s18  ;;  %p2479_p1 = scmp.lt.u32.totalorder %s2472_s18, %s3320_s11 }
  0xba   : > { %p2475_p9 = pnand %p2473_p7, %p2837_p8 }
  0xbc   : > { %p2476_p4 = pneg %p2475_p9 }
  0xbe   : > { %p2481_p3 = pnand %p2479_p1, %p2476_p4 }
  0xc0   : > { %2484 = shalt.err (!%p2481_p3)
}
  0xc1   : > { %s2485_s10 = scalar_lea.vmem %s560_s15, 16  ;;  %s2492_s3 = scalar_lea.vmem %s560_s15, 32 }
  0xc2   : > { %p2486_p10 = scmp.ne.s32.totalorder %s560_s15, %s2485_s10  ;;  %p2493_p13 = scmp.lt.s32.totalorder %s560_s15, %s560_s15 }
  0xc3   : > { %p2494_p0 = scmp.lt.s32.totalorder %s2492_s3, %s2485_s10 }
  0xc4   : > { %p2488_p11 = pnand %p2486_p10, %p2837_p8 }
  0xc5   : > { %p2495_p2 = por %p2494_p0, %p2493_p13 }
  0xc6   : > { %p2489_p12 = pneg %p2488_p11 }
  0xc8   : > { %p2496_p5 = pnand %p2495_p2, %p2489_p12 }
  0xca   : > { %2499 = shalt.err (!%p2496_p5)
}
  0xcb   : > { %2167 = dma.hbm_to_vmem [thread:$0]  (!%p2821_p6), %s3320_s11, 16, %s560_s15, [#allocation12]  }
  0xcc   : > { %s2667_s2 = smov [#allocation16]   ;;  %s2500_s1 = scalar_lea.hbm %s3322_s13, 16 }
  0xcd   : > { %s581_s16 = sshll.u32 %s2667_s2, 4  ;;  %p2501_p7 = scmp.ne.s32.totalorder %s3322_s13, %s2500_s1  ;;  %s582_s16 = int_to_ptr.vmem [resolvable:$true] %s581_s16 }
  0xce   : > { %p2507_p1 = scmp.lt.u32.totalorder %s2500_s1, %s3322_s13 }
  0xcf   : > { %p2503_p9 = pnand %p2501_p7, %p2837_p8 }
  0xd1   : > { %p2504_p4 = pneg %p2503_p9 }
  0xd3   : > { %p2509_p3 = pnand %p2507_p1, %p2504_p4 }
  0xd5   : > { %2512 = shalt.err (!%p2509_p3)
}
  0xd6   : > { %s2513_s15 = scalar_lea.vmem %s582_s16, 16  ;;  %s2520_s3 = scalar_lea.vmem %s582_s16, 32 }
  0xd7   : > { %p2514_p10 = scmp.ne.s32.totalorder %s582_s16, %s2513_s15  ;;  %p2521_p13 = scmp.lt.s32.totalorder %s582_s16, %s582_s16 }
  0xd8   : > { %p2522_p0 = scmp.lt.s32.totalorder %s2520_s3, %s2513_s15 }
  0xd9   : > { %p2516_p11 = pnand %p2514_p10, %p2837_p8 }
  0xda   : > { %p2523_p2 = por %p2522_p0, %p2521_p13 }
  0xdb   : > { %p2517_p12 = pneg %p2516_p11 }
  0xdd   : > { %p2524_p5 = pnand %p2523_p2, %p2517_p12 }
  0xdf   : > { %2527 = shalt.err (!%p2524_p5)
}
  0xe0   : > { %2173 = dma.hbm_to_vmem [thread:$0]  (!%p2821_p6), %s3322_s13, 16, %s582_s16, [#allocation15]  }
  0xe1   : > { %s1911_s23 = sadd.s32 4294967294, %s2656_s19   ;;  %s50_s2 = sadd.s32 1, %s2652_s0 }
  0xe2   : > { %p52_p8 = scmp.ge.s32.totalorder %s50_s2, 2  ;;  %s111_s25 = sadd.s32 1, %s2644_s29 }
  0xe3   : > { %p118_p7 = scmp.ne.s32.totalorder %s2644_s29, %s2640_s28  ;;  %p119_p9 = scmp.eq.s32.totalorder %s2656_s19, 0 }
  0xe4   : > { %s3392_s2 = smov (%p52_p8, %s50_s2), 0  ;;  %p124_p1 = scmp.ne.s32.totalorder %s2640_s28, %s2636_s27 }
  0xe5   : > { %p2999_p4 = por %p119_p9, %p118_p7  ;;  %s108_s16 = ssub.s32 %s2652_s0, %s3392_s2 }
  0xe6   : > { %s3364_s18 = sadd.s32 4294967295, %s2656_s19   ;;  %p109_p3 = scmp.eq.s32.totalorder %s108_s16, 0 }
  0xe7   : > { %p465_p6 = scmp.eq.s32.totalorder %s3364_s18, 1  ;;  %p3365_p10 = scmp.ne.s32.totalorder %s3354_s20, 0 }
  0xe8   : > { %p471_p13 = scmp.eq.s32.totalorder %s1911_s23, 1  ;;  %p2190_p2 = scmp.lt.s32.totalorder %s2656_s19, 2 }
  0xe9   : > { %p3011_p11 = por %p3365_p10, %p124_p1  ;;  %p3015_p12 = por %p465_p6, %p118_p7 }
  0xea   : > { %s3020_s14 = scalar_select %p109_p3, %s2644_s29, %s111_s25  }
  0xeb   : > { %s3367_s22 = scalar_select %p3015_p12, 1, 0 }
  0xec   : > { %p3022_p0 = por %p471_p13, %p124_p1  ;;  %s621_s10 = sand.u32 1, %s2644_s29  }
  0xed   : > { %s1922_s15 = sshll.u32 %s2652_s0, 4  ;;  %s3369_s26 = sld [smem:[#allocation26_spill]] }
  0xee   : > { %s3368_s17 = scalar_select %p3022_p0, 1, 0 }
  0xef   : > { %s624_s18 = scalar_lea.vmem [#allocation2], %s621_s10  ;;  %p3038_p5 = pnand %p2190_p2, %p2999_p4 }
  0xf0   : > { %s631_s23 = sshll.u32 %s624_s18, 4  ;;  %s622_s6 = scalar_lea.sflag [#allocation3], %s621_s10  ;;  %s3034_s23 = int_to_ptr.vmem [resolvable:$true] %s631_s23 }
  0xf1   : > { %p2530_p7 = pneg %p3038_p5 }
  0xf3   : > { %s3032_s16 = scalar_lea.hbm %s3369_s26, %s1922_s15  ;;  %s2533_s4 = scalar_lea.hbm %s3369_s26, 32 }
  0xf4   : > { %s2528_s7 = scalar_lea.hbm %s3032_s16, 16  ;;  %p2534_p4 = scmp.lt.u32.totalorder %s3032_s16, %s3369_s26 }
  0xf5   : > { %p2529_p8 = scmp.ne.s32.totalorder %s3032_s16, %s2528_s7  ;;  %p2535_p6 = scmp.lt.u32.totalorder %s2533_s4, %s2528_s7 }
  0xf6   : > { %p2537_p10 = scmp.lt.u32.totalorder %s2528_s7, %s3032_s16 }
  0xf7   : > { %p2531_p9 = pnand %p2530_p7, %p2529_p8  ;;  %p2536_p3 = por %p2535_p6, %p2534_p4 }
  0xf9   : > { %p2532_p1 = pneg %p2531_p9  ;;  %p2538_p13 = por %p2537_p10, %p2536_p3 }
  0xfb   : > { %p2539_p2 = pnand %p2538_p13, %p2532_p1 }
  0xfd   : > { %2542 = shalt.err (!%p2539_p2)
}
  0xfe   : > { %s2543_s10 = scalar_lea.vmem %s3034_s23, 16  ;;  %s2668_s15 = smov [#allocation2]  }
  0xff   : > { %p2544_p8 = scmp.ne.s32.totalorder %s3034_s23, %s2543_s10  ;;  %s2548_s3 = sshll.u32 %s2668_s15, 4  ;;  %s2549_s3 = int_to_ptr.vmem [resolvable:$false] %s2548_s3 }
 0x100   : > { %s2550_s24 = scalar_lea.vmem %s2549_s3, 32  ;;  %p2551_p12 = scmp.lt.s32.totalorder %s3034_s23, %s2549_s3 }
 0x101   : > { %p2546_p9 = pnand %p2544_p8, %p2530_p7  ;;  %p2552_p4 = scmp.lt.s32.totalorder %s2550_s24, %s2543_s10 }
 0x103   : > { %p2547_p0 = pneg %p2546_p9  ;;  %p2553_p6 = por %p2552_p4, %p2551_p12 }
 0x105   : > { %p2554_p3 = pnand %p2553_p6, %p2547_p0 }
 0x107   : > { %2557 = shalt.err (!%p2554_p3)
}
 0x108   : > { %2177 = dma.hbm_to_vmem [thread:$0]  (!%p3038_p5), %s3032_s16, 16, %s3034_s23, %s622_s6  }
 0x109   : > { %p3371_p1 = scmp.ne.s32.totalorder %s3355_s21, 0 }
 0x10a   : > { %s3070_s7 = sand.u32 (!%p3371_p1), 1, %s2640_s28  }
 0x10b   : > { %640 = sbr.rel (%p3371_p1) target bundleno = 2859 (0xb2b), region = 92  ;;  %s643_s4 = scalar_lea.sflag (!%p3371_p1), [#allocation3], %s3070_s7 }
 0x10c   : > { %s645_s18 = scalar_lea.vmem (!%p3371_p1), [#allocation2], %s3070_s7 }
 0x112   : > { %2611 = dma.done.wait (%p3011_p11), %s643_s4, 16  }
 0x113   : > { %2613 = vsyncadd (%p3011_p11), %s643_s4, 4294967280  ;;  %p3372_p12 = scmp.ne.s32.totalorder %s3354_s20, 0 }
 0x115   : > { %2615 = dma.done.wait (%p3372_p12), [#allocation6], 32  }
 0x116   : > { %2617 = vsyncadd (%p3372_p12), [#allocation6], 4294967264 }
 0x117   : > { %2619 = dma.done.wait (%p3372_p12), [#allocation9], 512  }
 0x118   : > { %2621 = vsyncadd (%p3372_p12), [#allocation9], 4294966784 }
 0x119   : > { %2623 = dma.done.wait (%p3372_p12), [#allocation12], 32  }
 0x11a   : > { %2625 = vsyncadd (%p3372_p12), [#allocation12], 4294967264 }
 0x11b   : > { %2627 = dma.done.wait (%p3372_p12), [#allocation15], 32  }
 0x11c   : > { %2629 = vsyncadd (%p3372_p12), [#allocation15], 4294967264  ;;  %p740_p11 = scmp.lt.s32.totalorder %s2648_s30, 1  ;;  %s3373_s23 = sld [smem:[#allocation25_spill]]  ;;  %vm757_vm0 = vcmask 261120   ;;  %v2266_v14 = vld [vmem:[#allocation8] sm:$0xff]  }
 0x11d   : > { %s3374_s3 = sld [smem:[#allocation24_spill]]  ;;  %s3375_s5 = sld [smem:[#allocation29_spill]]  ;;  %v2669_v16 = vmov 0.0   ;;  %v2268_v17 = vld [vmem:[#allocation8 + $0x8] sm:$0xff]   ;;  %vm2670_vm1 = vmmov 0   ;;  %v2270_v36 = vld [vmem:[#allocation10] sm:$0xff]  }
 0x11e   : > { %s741_s6 = scalar_select %p740_p11, %s2648_s30, 1  ;;  %2021 = vmatprep.subr.bf16.mxu1 %v2669_v16  ;;  %2013 = vmatprep.subr.bf16.mxu0 %v2669_v16  ;;  %v1936_v28 = vld [vmem:[#allocation5] ss:$0 sm:$0xff]  ;;  %vm1001_vm2 = vcmask 64512   ;;  %v1937_v43 = vld [vmem:[#allocation7] ss:$0 sm:$0xff] }
 0x11f   : > { %2022 = vmatpush3.bf16.msra.mxu1 %v2266_v14  ;;  %2025 = vmatprep.mubr.msk.bf16.mxu1 %vm2670_vm1, %v2669_v16  ;;  %v2271_v38 = vld [vmem:[#allocation10 + $0x8] sm:$0xff]   ;;  %s2672_s10 = smov 104   ;;  %v1944_v53 = vld [vmem:[#allocation11] ss:$0 sm:$0xff]  ;;  %vm1063_vm3 = vcmask 1043456   ;;  %s2673_s15 = smov 112  }
 0x120   : > { %s1933_s21 = sshll.u32 %s741_s6, 3  ;;  %2023 = vmatprep.subr.bf16.mxu1 %v2669_v16  ;;  %2017 = vmatprep.mubr.msk.bf16.mxu0 %vm2670_vm1, %v2669_v16  ;;  %s2674_s20 = smov 8   ;;  %vm1453_vm4 = vcmask 130048   ;;  %vm1455_vm5 = vcmask 195584   ;;  %vm1670_vm6 = vcmask 523264  }
 0x121   : > { %s2675_s4 = smov 16   ;;  %s2676_s1 = smov 24  }
 0x122   : > { %s750_s25 = scalar_lea.vmem %s3373_s23, %s1933_s21  ;;  %s3376_s23 = sld [smem:[#allocation27_spill]] }
 0x123   : > { %s746_s24 = scalar_lea.vmem %s3374_s3, %s1933_s21  ;;  %v753_v0 = vld [vmem:[%s750_s25] sm:$0xff]  ;;  %2024 = vmatpush3.bf16.msra.mxu1 %v2268_v17  ;;  %v2269_v18 = vld [vmem:[%s3375_s5 + $0x8] sm:$0xff]   ;;  %s2671_s25 = smov 120  }
 0x124   : > { %v3102_v1 = vld [vmem:[%s746_s24] sm:$0xff]  ;;  %v786_v2 = vsel %vm757_vm0, %v753_v0, 0.0  ;;  %2037 = vmatprep.subr.bf16.mxu1 %v2669_v16  ;;  %s3377_s24 = sld [smem:[#allocation32_spill]]  ;;  %s1932_s3 = sshll.u32 %s3070_s7, 3 }
 0x125   : > { %v758_v3 = vsel %vm757_vm0, %v3102_v1, 0.0  ;;  %787 = vadd.xlane.f32.xlu0 %v786_v2  ;;  %v2267_v15 = vld [vmem:[%s3375_s5] sm:$0xff]   ;;  %s3381_s21 = sld [smem:[#allocation36_spill]]  ;;  %s739_s16 = scalar_lea.vmem [#allocation17], %s1932_s3 }
 0x126   : > { %2014 = vmatpush3.bf16.msra.mxu0 %v2267_v15  ;;  %p3383_p5 = scmp.ne.s32.totalorder %s3367_s22, 0 }
 0x127   : > { %2015 = vmatprep.subr.bf16.mxu0 %v2669_v16 }
 0x128   : > { %v1935_v26 = vld [vmem:[%s3376_s23] ss:$0 sm:$0xff]  ;;  %s1731_s23 = sshll.u32 %s739_s16, 4  ;;  %s3261_s23 = int_to_ptr.vmem [resolvable:$true] %s1731_s23 }
 0x129   : > { %759 = vadd.xlane.f32.xlu0 %v758_v3  ;;  %s2558_s3 = scalar_lea.vmem %s3261_s23, 128 }
 0x12a   : > { %2016 = vmatpush3.bf16.msra.mxu0 %v2269_v18  ;;  %p2559_p0 = scmp.ne.s32.totalorder %s3261_s23, %s2558_s3 }
 0x12b   : > { %2029 = vmatprep.subr.bf16.mxu0 %v2669_v16 }
 0x12c   : > { %p2560_p7 = pnand %p2559_p0, %p3383_p5 }
 0x12e   : > { %p2561_p10 = pneg %p2560_p7 }
 0x1b2   : > { %v788_v4 = vpop.xlane.xlu0 %787 }
 0x1b3   : > { %v789_v5 = vmul.f32 0.03125, %v788_v4 }
 0x1b5   : > { %v790_v6 = vsub.f32 %v753_v0, %v789_v5 }
 0x1b6   : > { %v760_v7 = vpop.xlane.xlu0 %759 }
 0x1b7   : > { %v762_v8 = vmul.f32 0.03125, %v760_v7  ;;  %v791_v9 = vmul.f32 %v790_v6, %v790_v6  ;;  %v1948_v7 = vld [vmem:[%s645_s18] ss:$0 sm:$0xff]  ;;  %s3380_s18 = sld [smem:[#allocation34_spill]] }
 0x1b9   : > { %v763_v10 = vsub.f32 %v3102_v1, %v762_v8  ;;  %v792_v11 = vsel %vm757_vm0, %v791_v9, 0.0 }
 0x1ba   : > { %793 = vadd.xlane.f32.xlu1 %v792_v11 }
 0x1bb   : > { %v764_v12 = vmul.f32 %v763_v10, %v763_v10 }
 0x1bd   : > { %v765_v13 = vsel %vm757_vm0, %v764_v12, 0.0 }
 0x1be   : > { %766 = vadd.xlane.f32.xlu1 %v765_v13 }
 0x247   : > { %v794_v19 = vpop.xlane.xlu1 %793 }
 0x248   : > { %v795_v20 = vmul.f32 0.03125, %v794_v19 }
 0x24a   : > { %v796_v21 = vadd.f32 1e-06, %v795_v20 }
 0x24b   : > { %v767_v22 = vpop.xlane.xlu1 %766 }
 0x24c   : > { %2280 = vrsqrt.f32 %v796_v21  ;;  %v768_v23 = vmul.f32 0.03125, %v767_v22 }
 0x24e   : > { %v769_v24 = vadd.f32 1e-06, %v768_v23 }
 0x250   : > { %2282 = vrsqrt.f32 %v769_v24 }
 0x256   : > { %v2281_v25 = vpop.eup %2280 }
 0x257   : > { %v798_v27 = vmul.f32 %v2281_v25, %v790_v6 }
 0x259   : > { %v799_v29 = vmul.f32 %v1935_v26, %v798_v27 }
 0x25a   : > { %v2283_v30 = vpop.eup %2282 }
 0x25b   : > { %v800_v31 = vadd.f32 %v1936_v28, %v799_v29  ;;  %v771_v32 = vmul.f32 %v2283_v30, %v763_v10 }
 0x25d   : > { %v802_v33 = vpack.c.bf16 %v800_v31, %v800_v31  ;;  %v778_v34 = vmul.f32 %v1935_v26, %v771_v32 }
 0x25f   : > { %2026 = vmatmul.mubr.msk.bf16.vlgmr.msra.gmra.mrb[0].mxu1 %vm757_vm0, %v802_v33  ;;  %v785_v35 = vadd.f32 %v1936_v28, %v778_v34 }
 0x260   : > { %2039 = vmatprep.mubr.msk.bf16.mxu1 %vm2670_vm1, %v2669_v16 }
 0x261   : > { %v801_v37 = vpack.c.bf16 %v785_v35, %v785_v35 }
 0x263   : > { %2018 = vmatmul.mubr.msk.bf16.vlgmr.msra.gmra.mrb[0].mxu0 %vm757_vm0, %v801_v37 }
 0x264   : > { %2030 = vmatpush3.bf16.msra.mxu0 %v2270_v36  ;;  %2033 = vmatprep.mubr.msk.bf16.mxu0 %vm2670_vm1, %v2669_v16 }
 0x265   : > { %2031 = vmatprep.subr.bf16.mxu0 %v2669_v16 }
 0x268   : > { %2032 = vmatpush3.bf16.msra.mxu0 %v2271_v38 }
 0x269   : > { %2043 = vmatprep.subr.bf16.mxu0 %v2669_v16 }
 0x26b   : > { %2034 = vmatmul.mubr.msk.bf16.vlgmr.msra.gmra.mrb[4].mxu0 %vm757_vm0, %v802_v33 }
 0x26c   : > { %2045 = vmatprep.mubr.msk.bf16.mxu0 %vm2670_vm1, %v2669_v16 }
 0x332   : > { %v922_v39 = vpop.f32.mrb[0].mxu1 }
 0x333   : > { %v993_v40 = vpack.c.bf16 %v922_v39, %v922_v39  ;;  %v2027_v41 = vpop.f32.mrb[1].mxu1 }
 0x334   : > { %v925_v42 = vpop.f32.mrb[2].mxu1 }
 0x335   : > { %v2028_v44 = vpop.f32.mrb[3].mxu1  ;;  %1111 = vrot.lane.b32.xlu0 %v993_v40, %s2671_s25  ;;  %v1006_v45 = vsel %vm1001_vm2, %v993_v40, 0 }
 0x336   : > { %v863_v46 = vpop.f32.mrb[0].mxu0  ;;  %2038 = vmatpush3.bf16.xpose.msra.mxu1 %v1006_v45 }
 0x337   : > { %v864_v47 = vadd.f32 %v1937_v43, %v863_v46  ;;  %v2019_v48 = vpop.f32.mrb[1].mxu0  ;;  %2049 = vmatprep.subr.bf16.mxu1 %v2669_v16 }
 0x338   : > { %v866_v49 = vpop.f32.mrb[2].mxu0 }
 0x339   : > { %v991_v50 = vmul.f32 0.35355338, %v864_v47  ;;  %1332 = vrot.lane.b32.xlu0 %v993_v40, %s2672_s10  ;;  %v2020_v51 = vpop.f32.mrb[3].mxu0 }
 0x33b   : > { %v992_v52 = vpack.c.bf16 %v991_v50, %v991_v50 }
 0x33d   : > { %1108 = vrot.lane.b32.xlu1 %v992_v52, %s2671_s25  ;;  %2040 = vmatmul.mubr.msk.bf16.vlgmr.msra.gmra.mrb[4].mxu1 %vm1001_vm2, %v992_v52 }
 0x33e   : > { %v985_v54 = vpop.f32.mrb[4].mxu0  ;;  %2051 = vmatprep.mubr.msk.bf16.mxu1 %vm2670_vm1, %v2669_v16 }
 0x33f   : > { %v986_v55 = vadd.f32 %v1944_v53, %v985_v54  ;;  %v2035_v56 = vpop.f32.mrb[5].mxu0 }
 0x340   : > { %v988_v57 = vpop.f32.mrb[6].mxu0 }
 0x341   : > { %v3148_v58 = vpack.c.bf16 %v986_v55, %v986_v55  ;;  %1222 = vrot.lane.b32.xlu1 %v993_v40, %s2673_s15  ;;  %v2036_v59 = vpop.f32.mrb[7].mxu0 }
 0x343   : > { %v1065_v60 = vsel %vm1063_vm3, %v3148_v58, 0 }
 0x344   : > { %2044 = vmatpush3.bf16.msra.mxu0 %v1065_v60 }
 0x345   : > { %1220 = vrot.lane.b32.xlu1 %v992_v52, %s2673_s15  ;;  %2055 = vmatprep.subr.bf16.mxu0 %v2669_v16 }
 0x349   : > { %1330 = vrot.lane.b32.xlu1 %v992_v52, %s2672_s10 }
 0x3a7   : > { %v1112_v61 = vpop.permute.xlu0 %1111 }
 0x3a8   : > { %v1117_v62 = vsel %vm1001_vm2, %v1112_v61, 0 }
 0x3a9   : > { %2050 = vmatpush3.bf16.xpose.msra.mxu1 %v1117_v62 }
 0x3aa   : > { %2061 = vmatprep.subr.bf16.mxu1 %v2669_v16 }
 0x3ab   : > { %v1333_v3 = vpop.permute.xlu0 %1332 }
 0x3ac   : > { %v1338_v5 = vsel %vm1001_vm2, %v1333_v3, 0 }
 0x3af   : > { %v1109_v63 = vpop.permute.xlu1 %1108 }
 0x3b0   : > { %2052 = vmatmul.mubr.msk.bf16.vlgmr.msra.gmra.mrb[8].mxu1 %vm1001_vm2, %v1109_v63 }
 0x3b1   : > { %2063 = vmatprep.mubr.msk.bf16.mxu1 %vm2670_vm1, %v2669_v16 }
 0x3b3   : > { %v1223_v0 = vpop.permute.xlu1 %1222 }
 0x3b4   : > { %v1228_v2 = vsel %vm1001_vm2, %v1223_v0, 0 }
 0x3b5   : > { %2062 = vmatpush3.bf16.xpose.msra.mxu1 %v1228_v2 }
 0x3b6   : > { %2073 = vmatprep.subr.bf16.mxu1 %v2669_v16 }
 0x3b7   : > { %v1221_v4 = vpop.permute.xlu1 %1220 }
 0x3bb   : > { %v1331_v6 = vpop.permute.xlu1 %1330 }
 0x3bc   : > { %2064 = vmatmul.mubr.msk.bf16.vlgmr.msra.gmra.mrb[12].mxu1 %vm1001_vm2, %v1221_v4 }
 0x3bd   : > { %2074 = vmatpush3.bf16.xpose.msra.mxu1 %v1338_v5  ;;  %2075 = vmatprep.mubr.msk.bf16.mxu1 %vm2670_vm1, %v2669_v16 }
 0x3be   : > { %2085 = vmatprep.subr.bf16.mxu1 %v2669_v16 }
 0x3c4   : > { %2076 = vmatmul.mubr.msk.bf16.vlgmr.msra.gmra.mrb[16].mxu1 %vm1001_vm2, %v1331_v6 }
 0x3c5   : > { %2089 = vmatprep.mubr.msk.bf16.mxu1 %vm2670_vm1, %v2669_v16 }
 0x410   : > { %v1042_v8 = vpop.f32.mrb[4].mxu1 }
 0x411   : > { %v1043_v9 = vadd.f32 %v1948_v7, %v1042_v8  ;;  %v2041_v10 = vpop.f32.mrb[5].mxu1 }
 0x412   : > { %v1045_v11 = vpop.f32.mrb[6].mxu1 }
 0x413   : > { %v2042_v12 = vpop.f32.mrb[7].mxu1  ;;  %v1048_v13 = vsel %vm1001_vm2, %v1043_v9, -inf }
 0x414   : > { %1049 = vmax.xlane.f32.xlu0 %v1048_v13 }
 0x483   : > { %v1153_v14 = vpop.f32.mrb[8].mxu1 }
 0x484   : > { %v1154_v15 = vadd.f32 %v1948_v7, %v1153_v14  ;;  %v2053_v17 = vpop.f32.mrb[9].mxu1 }
 0x485   : > { %v1156_v18 = vpop.f32.mrb[10].mxu1  ;;  %v2272_v17 = vld [vmem:[%s3377_s24] sm:$0xff]  }
 0x486   : > { %v2054_v19 = vpop.f32.mrb[11].mxu1  ;;  %v1159_v20 = vsel %vm1001_vm2, %v1154_v15, -inf  ;;  %2086 = vmatpush3.bf16.msra.mxu1 %v2272_v17 }
 0x487   : > { %1160 = vmax.xlane.f32.xlu1 %v1159_v20  ;;  %2087 = vmatprep.subr.bf16.mxu1 %v2669_v16 }
 0x48f   : > { %v1264_v21 = vpop.f32.mrb[12].mxu1 }
 0x490   : > { %v1265_v22 = vadd.f32 %v1948_v7, %v1264_v21  ;;  %v2065_v23 = vpop.f32.mrb[13].mxu1 }
 0x491   : > { %v1267_v24 = vpop.f32.mrb[14].mxu1 }
 0x492   : > { %v2066_v25 = vpop.f32.mrb[15].mxu1  ;;  %v1270_v26 = vsel %vm1001_vm2, %v1265_v22, -inf }
 0x493   : > { %1271 = vmax.xlane.f32.xlu0 %v1270_v26  ;;  %v2273_v26 = vld [vmem:[%s3377_s24 + $0x8] sm:$0xff]  }
 0x494   : > { %2088 = vmatpush3.bf16.msra.mxu1 %v2273_v26 }
 0x495   : > { %2101 = vmatprep.subr.bf16.mxu1 %v2669_v16 }
 0x497   : > { %v1374_v27 = vpop.f32.mrb[16].mxu1 }
 0x498   : > { %v1375_v28 = vadd.f32 %v1948_v7, %v1374_v27  ;;  %v2077_v29 = vpop.f32.mrb[17].mxu1 }
 0x499   : > { %v1377_v30 = vpop.f32.mrb[18].mxu1 }
 0x49a   : > { %v2078_v31 = vpop.f32.mrb[19].mxu1  ;;  %v1380_v32 = vsel %vm1001_vm2, %v1375_v28, -inf }
 0x49b   : > { %1381 = vmax.xlane.f32.xlu0 %v1380_v32 }
 0x4a1   : > { %v1050_v33 = vpop.xlane.xlu0 %1049 }
 0x4a2   : > { %v1051_v34 = vsub.f32 %v1043_v9, %v1050_v33 }
 0x4a4   : > { %v1052_v35 = vmul.f32 1.442695, %v1051_v34 }
 0x4a6   : > { %2284 = vpow2.f32 %v1052_v35 }
 0x4b0   : > { %v2285_v36 = vpop.eup %2284 }
 0x4b1   : > { %v1054_v37 = vsel %vm1001_vm2, %v2285_v36, 0.0 }
 0x4b2   : > { %1055 = vadd.xlane.f32.xlu0 %v1054_v37 }
 0x514   : > { %v1161_v38 = vpop.xlane.xlu1 %1160 }
 0x515   : > { %v1162_v39 = vsub.f32 %v1154_v15, %v1161_v38  ;;  %v1957_v38 = vld [vmem:[#allocation13] ss:$0 sm:$0xff] }
 0x517   : > { %v1163_v40 = vmul.f32 1.442695, %v1162_v39 }
 0x519   : > { %2286 = vpow2.f32 %v1163_v40 }
 0x520   : > { %v1272_v41 = vpop.xlane.xlu0 %1271 }
 0x521   : > { %v1273_v42 = vsub.f32 %v1265_v22, %v1272_v41 }
 0x523   : > { %v2287_v43 = vpop.eup %2286  ;;  %v1274_v44 = vmul.f32 1.442695, %v1273_v42 }
 0x524   : > { %v1165_v45 = vsel %vm1001_vm2, %v2287_v43, 0.0 }
 0x525   : > { %2288 = vpow2.f32 %v1274_v44  ;;  %1166 = vadd.xlane.f32.xlu1 %v1165_v45 }
 0x528   : > { %v1382_v48 = vpop.xlane.xlu0 %1381 }
 0x529   : > { %v1383_v50 = vsub.f32 %v1375_v28, %v1382_v48 }
 0x52b   : > { %v1384_v51 = vmul.f32 1.442695, %v1383_v50 }
 0x52f   : > { %v2289_v46 = vpop.eup %2288 }
 0x530   : > { %v1276_v47 = vsel %vm1001_vm2, %v2289_v46, 0.0 }
 0x531   : > { %1277 = vadd.xlane.f32.xlu0 %v1276_v47 }
 0x536   : > { %1282 = vrot.lane.b32.xlu1 %v3148_v58, %s2673_s15 }
 0x53f   : > { %v1056_v49 = vpop.xlane.xlu0 %1055 }
 0x540   : > { %2290 = vrcp.f32 %v1056_v49 }
 0x541   : > { %2292 = vpow2.f32 %v1384_v51 }
 0x547   : > { %1172 = vrot.lane.b32.xlu0 %v3148_v58, %s2671_s25  ;;  %s3378_s25 = sld [smem:[#allocation33_spill]] }
 0x54a   : > { %v2291_v52 = vpop.eup %2290 }
 0x54b   : > { %v1058_v53 = vmul.f32 %v2291_v52, %v2285_v36  ;;  %v2293_v55 = vpop.eup %2292 }
 0x54c   : > { %v1386_v56 = vsel %vm1001_vm2, %v2293_v55, 0.0 }
 0x54d   : > { %v1059_v54 = vpack.c.bf16 %v1058_v53, %v1058_v53  ;;  %v2274_v51 = vld [vmem:[%s3378_s25] sm:$0xff]  }
 0x54f   : > { %2046 = vmatmul.mubr.msk.bf16.vlgmr.msra.gmra.mrb[8].mxu0 %vm1001_vm2, %v1059_v54 }
 0x550   : > { %2057 = vmatprep.mubr.msk.bf16.mxu0 %vm2670_vm1, %v2669_v16 }
 0x55a   : > { %1387 = vadd.xlane.f32.xlu1 %v1386_v56  ;;  %v1961_v56 = vld [vmem:[#allocation14] ss:$0 sm:$0xff] }
 0x56b   : > { %1392 = vrot.lane.b32.xlu1 %v3148_v58, %s2672_s10 }
 0x5b2   : > { %v1167_v57 = vpop.xlane.xlu1 %1166 }
 0x5b3   : > { %2294 = vrcp.f32 %v1167_v57 }
 0x5b6   : > { %v1283_v0 = vpop.permute.xlu1 %1282 }
 0x5b7   : > { %v1288_v3 = vsel %vm1063_vm3, %v1283_v0, 0 }
 0x5bd   : > { %v2295_v59 = vpop.eup %2294 }
 0x5be   : > { %v1278_v60 = vpop.xlane.xlu0 %1277  ;;  %v1169_v61 = vmul.f32 %v2295_v59, %v2287_v43  ;;  %v1962_v59 = vld [vmem:[#allocation16] ss:$0 sm:$0xff] }
 0x5bf   : > { %2296 = vrcp.f32 %v1278_v60 }
 0x5c0   : > { %v1170_v2 = vpack.c.bf16 %v1169_v61, %v1169_v61 }
 0x5c2   : > { %v1173_v62 = vpop.permute.xlu0 %1172 }
 0x5c3   : > { %v1178_v63 = vsel %vm1063_vm3, %v1173_v62, 0 }
 0x5c4   : > { %2056 = vmatpush3.bf16.msra.mxu0 %v1178_v63 }
 0x5c5   : > { %2067 = vmatprep.subr.bf16.mxu0 %v2669_v16 }
 0x5c7   : > { %2058 = vmatmul.mubr.msk.bf16.vlgmr.msra.gmra.mrb[12].mxu0 %vm1001_vm2, %v1170_v2 }
 0x5c8   : > { %2068 = vmatpush3.bf16.msra.mxu0 %v1288_v3  ;;  %2069 = vmatprep.mubr.msk.bf16.mxu0 %vm2670_vm1, %v2669_v16 }
 0x5c9   : > { %v2297_v58 = vpop.eup %2296  ;;  %2079 = vmatprep.subr.bf16.mxu0 %v2669_v16 }
 0x5ca   : > { %v1280_v4 = vmul.f32 %v2297_v58, %v2289_v46  ;;  %v1963_v58 = vld [vmem:[%s3380_s18] ss:$0 sm:$0xff]  ;;  %s3382_s18 = sld [smem:[#allocation37_spill]] }
 0x5cc   : > { %v1281_v5 = vpack.c.bf16 %v1280_v4, %v1280_v4 }
 0x5cf   : > { %2070 = vmatmul.mubr.msk.bf16.vlgmr.msra.gmra.mrb[16].mxu0 %vm1001_vm2, %v1281_v5 }
 0x5d0   : > { %2081 = vmatprep.mubr.msk.bf16.mxu0 %vm2670_vm1, %v2669_v16 }
 0x5e7   : > { %v1388_v6 = vpop.xlane.xlu1 %1387 }
 0x5e8   : > { %2298 = vrcp.f32 %v1388_v6 }
 0x5eb   : > { %v1393_v7 = vpop.permute.xlu1 %1392 }
 0x5ec   : > { %v1398_v8 = vsel %vm1063_vm3, %v1393_v7, 0 }
 0x5ed   : > { %2080 = vmatpush3.bf16.msra.mxu0 %v1398_v8 }
 0x5ee   : > { %2093 = vmatprep.subr.bf16.mxu0 %v2669_v16 }
 0x5f2   : > { %v2299_v9 = vpop.eup %2298 }
 0x5f3   : > { %v1390_v10 = vmul.f32 %v2299_v9, %v2293_v55 }
 0x5f5   : > { %v1391_v11 = vpack.c.bf16 %v1390_v10, %v1390_v10 }
 0x5f7   : > { %2082 = vmatmul.mubr.msk.bf16.vlgmr.msra.gmra.mrb[20].mxu0 %vm1001_vm2, %v1391_v11 }
 0x5f8   : > { %2097 = vmatprep.mubr.msk.bf16.mxu0 %vm2670_vm1, %v2669_v16  ;;  %2094 = vmatpush3.bf16.msra.mxu0 %v2274_v51 }
 0x5f9   : > { %2095 = vmatprep.subr.bf16.mxu0 %v2669_v16 }
 0x622   : > { %v1101_v12 = vpop.f32.mrb[8].mxu0 }
 0x623   : > { %v2047_v13 = vpop.f32.mrb[9].mxu0 }
 0x624   : > { %v1104_v14 = vpop.f32.mrb[10].mxu0 }
 0x625   : > { %v2048_v15 = vpop.f32.mrb[11].mxu0 }
 0x69a   : > { %v1214_v18 = vpop.f32.mrb[12].mxu0 }
 0x69b   : > { %1441 = vrot.lane.b32.xlu1 %v1214_v18, %s2674_s20  ;;  %v2059_v19 = vpop.f32.mrb[13].mxu0  ;;  %s3379_s20 = sld [smem:[#allocation35_spill]] }
 0x69c   : > { %v1217_v20 = vpop.f32.mrb[14].mxu0  ;;  %v1967_v19 = vld [vmem:[%s3381_s21] ss:$0 sm:$0xff] }
 0x69d   : > { %v2060_v21 = vpop.f32.mrb[15].mxu0 }
 0x6a1   : > { %v2276_v63 = vld [vmem:[%s3379_s20] sm:$0xff]   ;;  %v2277_v0 = vld [vmem:[%s3379_s20 + $0x8] sm:$0xff]   ;;  %v2278_v2 = vld [vmem:[%s3379_s20 + $0x10] sm:$0xff]  }
 0x6a2   : > { %v1324_v22 = vpop.f32.mrb[16].mxu0  ;;  %v2279_v3 = vld [vmem:[%s3379_s20 + $0x18] sm:$0xff]  }
 0x6a3   : > { %1445 = vrot.lane.b32.xlu0 %v1324_v22, %s2675_s4  ;;  %v2071_v23 = vpop.f32.mrb[17].mxu0  ;;  %s2677_s4 = smov [#allocation17]  }
 0x6a4   : > { %v1327_v24 = vpop.f32.mrb[18].mxu0  ;;  %s2562_s6 = sshll.u32 %s2677_s4, 4  ;;  %s2563_s6 = int_to_ptr.vmem [resolvable:$false] %s2562_s6 }
 0x6a5   : > { %v2072_v25 = vpop.f32.mrb[19].mxu0  ;;  %s2564_s21 = scalar_lea.vmem %s2563_s6, 256  ;;  %p2565_p13 = scmp.lt.s32.totalorder %s3261_s23, %s2563_s6 }
 0x6a6   : > { %p2566_p2 = scmp.lt.s32.totalorder %s2564_s21, %s2558_s3 }
 0x6a8   : > { %p2567_p8 = por %p2566_p2, %p2565_p13 }
 0x6aa   : > { %p2568_p9 = pnand %p2567_p8, %p2561_p10 }
 0x6ca   : > { %v1434_v27 = vpop.f32.mrb[20].mxu0 }
 0x6cb   : > { %1449 = vrot.lane.b32.xlu1 %v1434_v27, %s2676_s1  ;;  %v2083_v28 = vpop.f32.mrb[21].mxu0  ;;  %s1974_s1 = sshll.u32 %s2648_s30, 7  ;;  %s1717_s30 = scalar_lea.sflag [#allocation4], %s3070_s7 }
 0x6cc   : > { %v1437_v29 = vpop.f32.mrb[22].mxu0  ;;  %s3259_s5 = scalar_lea.hbm %s3382_s18, %s1974_s1 }
 0x6cd   : > { %v2084_v30 = vpop.f32.mrb[23].mxu0 }
 0x70d   : > { %v1442_v31 = vpop.permute.xlu1 %1441 }
 0x70e   : > { %v1452_v33 = vsel %vm1001_vm2, %v1101_v12, %v1442_v31 }
 0x715   : > { %v1446_v32 = vpop.permute.xlu0 %1445 }
 0x716   : > { %v1454_v34 = vsel %vm1453_vm4, %v1452_v33, %v1446_v32 }
 0x73d   : > { %v1450_v35 = vpop.permute.xlu1 %1449 }
 0x73e   : > { %v1456_v36 = vsel %vm1455_vm5, %v1454_v34, %v1450_v35 }
 0x73f   : > { %v1457_v37 = vpack.c.bf16 %v1456_v36, %v1456_v36 }
 0x741   : > { %2090 = vmatmul.mubr.msk.bf16.vlgmr.msra.gmra.mrb[20].mxu1 %vm757_vm0, %v1457_v37 }
 0x742   : > { %2109 = vmatprep.mubr.msk.bf16.mxu1 %vm2670_vm1, %v2669_v16  ;;  %2102 = vmatpush3.bf16.msra.mxu1 %v2276_v63 }
 0x743   : > { %2103 = vmatprep.subr.bf16.mxu1 %v2669_v16 }
 0x746   : > { %2104 = vmatpush3.bf16.msra.mxu1 %v2277_v0 }
 0x747   : > { %2105 = vmatprep.subr.bf16.mxu1 %v2669_v16 }
 0x74a   : > { %2106 = vmatpush3.bf16.msra.mxu1 %v2278_v2 }
 0x74b   : > { %2107 = vmatprep.subr.bf16.mxu1 %v2669_v16 }
 0x74e   : > { %2108 = vmatpush3.bf16.msra.mxu1 %v2279_v3 }
 0x814   : > { %v1518_v39 = vpop.f32.mrb[20].mxu1 }
 0x815   : > { %v1519_v40 = vadd.f32 %v1957_v38, %v1518_v39  ;;  %v2091_v41 = vpop.f32.mrb[21].mxu1 }
 0x816   : > { %v1521_v42 = vpop.f32.mrb[22].mxu1 }
 0x817   : > { %v3218_v43 = vadd.f32 %v1519_v40, %v3102_v1  ;;  %v2092_v44 = vpop.f32.mrb[23].mxu1  ;;  %v2275_v1 = vld [vmem:[%s3378_s25 + $0x8] sm:$0xff]  }
 0x818   : > { %2096 = vmatpush3.bf16.msra.mxu0 %v2275_v1 }
 0x819   : > { %v1527_v45 = vsel %vm757_vm0, %v3218_v43, 0.0 }
 0x81a   : > { %1528 = vadd.xlane.f32.xlu0 %v1527_v45 }
 0x8a7   : > { %v1529_v46 = vpop.xlane.xlu0 %1528 }
 0x8a8   : > { %v1530_v47 = vmul.f32 0.03125, %v1529_v46 }
 0x8aa   : > { %v1531_v48 = vsub.f32 %v3218_v43, %v1530_v47 }
 0x8ac   : > { %v1532_v49 = vmul.f32 %v1531_v48, %v1531_v48 }
 0x8ae   : > { %v1533_v50 = vsel %vm757_vm0, %v1532_v49, 0.0 }
 0x8af   : > { %1534 = vadd.xlane.f32.xlu1 %v1533_v50 }
 0x93c   : > { %v1535_v52 = vpop.xlane.xlu1 %1534 }
 0x93d   : > { %v1536_v53 = vmul.f32 0.03125, %v1535_v52 }
 0x93f   : > { %v1537_v54 = vadd.f32 1e-06, %v1536_v53 }
 0x941   : > { %2300 = vrsqrt.f32 %v1537_v54 }
 0x94b   : > { %v2301_v55 = vpop.eup %2300 }
 0x94c   : > { %v1539_v57 = vmul.f32 %v2301_v55, %v1531_v48 }
 0x94e   : > { %v1546_v60 = vmul.f32 %v1961_v56, %v1539_v57 }
 0x950   : > { %v1553_v61 = vadd.f32 %v1962_v59, %v1546_v60 }
 0x952   : > { %v1554_v62 = vpack.c.bf16 %v1553_v61, %v1553_v61 }
 0x954   : > { %2098 = vmatmul.mubr.msk.bf16.vlgmr.msra.gmra.mrb[24].mxu0 %vm757_vm0, %v1554_v62 }
 0xa27   : > { %v1615_v4 = vpop.f32.mrb[24].mxu0 }
 0xa28   : > { %v1616_v5 = vadd.f32 %v1963_v58, %v1615_v4  ;;  %v2099_v6 = vpop.f32.mrb[25].mxu0 }
 0xa29   : > { %v1618_v7 = vpop.f32.mrb[26].mxu0 }
 0xa2a   : > { %v1622_v8 = vmul.f32 0.044715, %v1616_v5  ;;  %v2100_v9 = vpop.f32.mrb[27].mxu0  ;;  %v1621_v16 = vmul.f32 0.5, %v1616_v5 }
 0xa2c   : > { %v1623_v10 = vmul.f32 %v1622_v8, %v1616_v5 }
 0xa2e   : > { %v1624_v11 = vmul.f32 %v1623_v10, %v1616_v5 }
 0xa30   : > { %v1625_v12 = vadd.f32 %v1624_v11, %v1616_v5 }
 0xa32   : > { %v1626_v13 = vmul.f32 0.7978846, %v1625_v12 }
 0xa34   : > { %2302 = vtanh.f32 %v1626_v13 }
 0xa3e   : > { %v2303_v14 = vpop.eup %2302 }
 0xa3f   : > { %v1628_v15 = vadd.f32 1.0, %v2303_v14 }
 0xa41   : > { %v1629_v17 = vmul.f32 %v1628_v15, %v1621_v16 }
 0xa43   : > { %v1630_v18 = vpack.c.bf16 %v1629_v17, %v1629_v17 }
 0xa45   : > { %2110 = vmatmul.mubr.msk.bf16.vlgmr.msra.gmra.mrb[24].mxu1 %vm1670_vm6, %v1630_v18 }
 0xb18   : > { %v1708_v20 = vpop.f32.mrb[24].mxu1 }
 0xb19   : > { %v1709_v21 = vadd.f32 %v1967_v19, %v1708_v20  ;;  %v2111_v22 = vpop.f32.mrb[25].mxu1 }
 0xb1a   : > { %v1711_v23 = vpop.f32.mrb[26].mxu1 }
 0xb1b   : > { %v1714_v24 = vadd.f32 %v1709_v21, %v3218_v43  ;;  %v2112_v25 = vpop.f32.mrb[27].mxu1 }
 0xb1d   : > { %1715 = vst.msk [vmem:[%s739_s16] sm:$0xff] %vm757_vm0, %v1714_v24 }
 0xb1e   : > { %2571 = shalt.err (!%p2568_p9)
}
 0xb1f   : > { %s2572_s7 = scalar_lea.hbm %s3259_s5, 128  ;;  %s2576_s10 = scalar_lea.hbm %s3382_s18, 256 }
 0xb20   : > { %p2573_p4 = scmp.ne.s32.totalorder %s3259_s5, %s2572_s7  ;;  %p2577_p1 = scmp.lt.u32.totalorder %s3259_s5, %s3382_s18 }
 0xb21   : > { %p2578_p12 = scmp.lt.u32.totalorder %s2576_s10, %s2572_s7  ;;  %p2580_p0 = scmp.lt.u32.totalorder %s2572_s7, %s3259_s5 }
 0xb22   : > { %p2574_p6 = pnand %p2573_p4, %p3383_p5 }
 0xb23   : > { %p2579_p11 = por %p2578_p12, %p2577_p1 }
 0xb24   : > { %p2575_p3 = pneg %p2574_p6 }
 0xb25   : > { %p2581_p7 = por %p2580_p0, %p2579_p11 }
 0xb27   : > { %p2582_p10 = pnand %p2581_p7, %p2575_p3 }
 0xb29   : > { %2585 = shalt.err (!%p2582_p10)
}
 0xb2a   : > { %2147 = dma.vmem_to_hbm [thread:$0]  (%p3383_p5), %s3261_s23, 128, %s3259_s5, %s1717_s30  }
 0xb2b PF: > { %s1743_s3 = sand.u32 1, %s2636_s27   ;;  %p3384_p13 = scmp.ne.s32.totalorder %s3368_s17, 0 }
 0xb2c   : > { %p3385_p2 = scmp.ge.s32.totalorder %s2656_s19, 2  ;;  %s1744_s6 = scalar_lea.sflag [#allocation4], %s1743_s3 }
 0xb2e   : > { %p2179_p8 = pnand %p3385_p2, %p3384_p13 }
 0xb30   : > { %2631 = dma.done.wait (!%p2179_p8), %s1744_s6, 128  }
 0xb31   : > { %2633 = vsyncadd (!%p2179_p8), %s1744_s6, 4294967168  ;;  %s38_s19 = sadd.s32 1, %s2656_s19   ;;  %s3386_s27 = smov %s2640_s28 }
 0xb32   : > { %p35_p9 = scmp.ge.s32.totalorder %s38_s19, 4   ;;  %s3387_s28 = smov %s2644_s29 }
 0xb33   : > { %s3388_s29 = smov %s3020_s14  ;;  %s3389_s30 = smov %s2652_s0 }
 0xb34   : > { %s3390_s0 = smov %s3392_s2  ;;  %37 = sbr.rel (!%p35_p9) target bundleno = 25 (0x19), region = 175 }
 0xb3b   :  { %1749 = vsyncpa [#allocation3], 1 }
 0xb3c   :  { %1751 = vsyncpa [#allocation3 + $0x1], 1 }
 0xb3d   :  { %1752 = vsyncpa [#allocation6], 1 }
 0xb3e   :  { %1753 = vsyncpa [#allocation9], 1 }
 0xb3f   :  { %1754 = vsyncpa [#allocation12], 1 }
 0xb40   :  { %1755 = vsyncpa [#allocation15], 1 }
 0xb41   :  { %1756 = vsyncpa [#allocation4], 1 }
 0xb42   :  { %1758 = vsyncpa [#allocation4 + $0x1], 1 }

</bundles_post_ra>
